<compile_context>
chip_gen: v7x
topology: tpu7x:2x2x1
jax: 0.10.0
libtpu: 0.0.40
codegen_flags: <defaults>
</compile_context>

<pallas_src>
import jax
import jax.numpy as jnp
from jax import lax
from jax.experimental import pallas as pl
from jax.experimental.pallas import tpu as pltpu

BN_EPS = 1e-5


# ----------------------------- Pallas kernel --------------------------------

def fused_convblock_kernel(x_ref, temb_ref, e_ref,
                           mw1_ref, mb1_ref, mw2_ref, mb2_ref,
                           sup_ref, sdn_ref,
                           m1_ref, b1_ref, g1_ref, be1_ref,
                           m2_ref, b2_ref, g2_ref, be2_ref,
                           a_ref, o_ref):
    """t = MLP(t_emb); y = ReLU(BN2(conv2(ReLU(BN1(conv1(x + t))))))."""
    f32 = jnp.float32

    # ---- time-embedding MLP (tiny; executed once since grid=(1,)) ----------
    t = jnp.dot(temb_ref[...], mw1_ref[...], preferred_element_type=f32) + mb1_ref[...]
    t = jnp.maximum(t, 0.0)
    # mlp_w2 / mlp_b2 are pre-folded with the lane-replication matrix, so this
    # directly yields the lane-dense additive term per batch element.
    t = jnp.dot(t, mw2_ref[...], preferred_element_type=f32) + mb2_ref[...]    # (N, W*Cin)
    # Row-expansion (N -> N*H rows) and broadcast-add, all lane-dense.
    x0 = x_ref[...] + jnp.dot(e_ref[...], t, preferred_element_type=f32)       # (rows, W*Cin)

    def conv3x3(z, m_ref, bias_l):
        # Row shifts h-1 / h+1 (zero at image boundaries) via 0/1 shift
        # matrices on the MXU: no relayout, no halo scratch, no masked stores.
        zu = jnp.dot(sup_ref[...], z, preferred_element_type=f32)   # z at row h-1
        zd = jnp.dot(sdn_ref[...], z, preferred_element_type=f32)   # z at row h+1
        # 3x3 conv == 3 banded row matmuls (dx taps + SAME padding baked in).
        y = jnp.dot(z, m_ref[1], preferred_element_type=f32)
        y += jnp.dot(zu, m_ref[0], preferred_element_type=f32)
        y += jnp.dot(zd, m_ref[2], preferred_element_type=f32)
        return y + bias_l

    def bn_relu(y, g_l, be_l):
        # Train-mode BatchNorm2d (biased variance) in lane-dense layout.
        # mean over rows (sublane reduce) then @A: reduces over W and
        # re-broadcasts the per-channel stat across all W lane slots.
        mean_l = jnp.dot(jnp.mean(y, axis=0, keepdims=True), a_ref[...],
                         preferred_element_type=f32)
        yc = y - mean_l
        var_l = jnp.dot(jnp.mean(yc * yc, axis=0, keepdims=True), a_ref[...],
                        preferred_element_type=f32)
        return jnp.maximum(yc * (g_l * lax.rsqrt(var_l + BN_EPS)) + be_l, 0.0)

    # ---- stage 1: conv1 + BN1 + ReLU (stays resident, lane-dense) ----------
    y1 = bn_relu(conv3x3(x0, m1_ref, b1_ref[...]), g1_ref[...], be1_ref[...])
    # ---- stage 2: conv2 + BN2 + ReLU (same layout, no relayout) ------------
    y2 = bn_relu(conv3x3(y1, m2_ref, b2_ref[...]), g2_ref[...], be2_ref[...])

    # ---- lane-dense store: last dim W*Cout (=128 here) -> unmasked vst -----
    o_ref[...] = y2


# ------------------------------- wrapper -------------------------------------

def _full_spec(shape):
    return pl.BlockSpec(shape, lambda i: (0,) * len(shape))


def _band_conv_matrix(w_hwio, width):
    """(3,3,Cin,Cout) HWIO conv weights -> (3, W*Cin, W*Cout) banded matrices.

    M[ky, wi*Cin+ci, wo*Cout+co] = w[ky, wi-wo+1, ci, co] if |wi-wo| <= 1 else 0.
    """
    kh, kw, cin, cout = w_hwio.shape
    wi = jnp.arange(width)[:, None]
    wo = jnp.arange(width)[None, :]
    kx = wi - wo + 1
    valid = ((kx >= 0) & (kx < kw)).astype(w_hwio.dtype)
    kx_c = jnp.clip(kx, 0, kw - 1)
    taps = w_hwio[:, kx_c, :, :] * valid[None, :, :, None, None]   # (kh, W, W, cin, cout)
    return jnp.transpose(taps, (0, 1, 3, 2, 4)).reshape(kh, width * cin, width * cout)


def conv_block_forward(x_nchw, t_emb, p):
    """ConvBlock.forward(x, t): t = mlp(t); y = convs(x + t.view(N,C,1,1))."""
    N, Cin, H, W = x_nchw.shape
    Cout = p["conv1_w"].shape[-1]
    rows = N * H
    d_in = W * Cin
    d_out = W * Cout

    # NCHW -> NHWC -> lane-dense (N*H, W*Cin)
    x_ld = jnp.transpose(x_nchw, (0, 2, 3, 1)).reshape(rows, d_in)

    # ---- one-time weight/layout prep (wrapper-side XLA) ---------------------
    m1 = _band_conv_matrix(p["conv1_w"], W)            # (3, W*Cin,  W*Cout)
    m2 = _band_conv_matrix(p["conv2_w"], W)            # (3, W*Cout, W*Cout)

    def tile_lanes(v, c):                              # (1, c) -> (1, W*c), channel-fastest
        return jnp.tile(v.reshape(1, c), (1, W))

    b1_l, g1_l, be1_l = (tile_lanes(p["conv1_b"], Cout),
                         tile_lanes(p["bn1_gamma"], Cout),
                         tile_lanes(p["bn1_beta"], Cout))
    b2_l, g2_l, be2_l = (tile_lanes(p["conv2_b"], Cout),
                         tile_lanes(p["bn2_gamma"], Cout),
                         tile_lanes(p["bn2_beta"], Cout))

    # Fold the lane replication of the (x + t) broadcast into the MLP layer 2.
    t_rep = jnp.tile(jnp.eye(Cin, dtype=jnp.float32), (1, W))     # (Cin, W*Cin)
    mw2_l = jnp.dot(p["mlp_w2"], t_rep)                           # (Cin, W*Cin)
    mb2_l = jnp.dot(p["mlp_b2"], t_rep)                           # (1,  W*Cin)

    # Row-expansion matrix (batch -> N*H rows): E[n*H+h, n'] = 1[n == n'].
    e_rows = (jnp.arange(rows)[:, None] // H ==
              jnp.arange(N)[None, :]).astype(jnp.float32)

    # h-1 / h+1 row-shift matrices with image-boundary zeroing baked in.
    r = jnp.arange(rows)
    sup = ((r[:, None] - 1 == r[None, :]) &
           (r[:, None] % H != 0)).astype(jnp.float32)             # (rows, rows)
    sdn = ((r[:, None] + 1 == r[None, :]) &
           (r[:, None] % H != H - 1)).astype(jnp.float32)

    # Channel averaging + lane-dense re-broadcast: A[i,j] = 1/W iff i%Cout==j%Cout.
    lane = jnp.arange(d_out)
    a_avg = ((lane[:, None] % Cout) ==
             (lane[None, :] % Cout)).astype(jnp.float32) / W      # (d_out, d_out)

    args = (x_ld, t_emb, e_rows,
            p["mlp_w1"], p["mlp_b1"], mw2_l, mb2_l,
            sup, sdn,
            m1, b1_l, g1_l, be1_l,
            m2, b2_l, g2_l, be2_l,
            a_avg)

    flops = int(6 * rows * d_in * d_out            # conv1: 3 banded matmuls
                + 6 * rows * d_out * d_out         # conv2: 3 banded matmuls
                + 4 * rows * rows * (d_in + d_out)  # row-shift matmuls
                + 8 * d_out * d_out                # BN stat matmuls
                + 2 * rows * N * d_in              # t broadcast
                + 2 * N * t_emb.shape[1] * Cin + 2 * N * Cin * d_in   # MLP
                + 16 * rows * d_out)               # BN/ReLU epilogues
    bytes_accessed = int(4 * (sum(int(a.size) for a in args) + rows * d_out))

    out = pl.pallas_call(
        fused_convblock_kernel,
        grid=(1,),
        in_specs=[_full_spec(a.shape) for a in args],
        out_specs=_full_spec((rows, d_out)),
        out_shape=jax.ShapeDtypeStruct((rows, d_out), jnp.float32),
        compiler_params=pltpu.CompilerParams(
            dimension_semantics=("arbitrary",),
            vmem_limit_bytes=32 * 1024 * 1024),
        cost_estimate=pl.CostEstimate(flops=flops,
                                      transcendentals=2 * d_out,
                                      bytes_accessed=bytes_accessed),
    )(*args)

    y = out.reshape(N, H, W, Cout)                 # un-flatten lane-dense output
    return jnp.transpose(y, (0, 3, 1, 2))          # NHWC -> NCHW


# -------------------------- deterministic params ----------------------------

def init_params(key, in_ch, out_ch, time_embed_dim):
    ks = jax.random.split(key, 8)

    def u(k, shape, fan_in):
        bound = 1.0 / (fan_in ** 0.5)
        return jax.random.uniform(k, shape, jnp.float32, -bound, bound)

    return dict(
        mlp_w1=u(ks[0], (time_embed_dim, in_ch), time_embed_dim),
        mlp_b1=u(ks[1], (1, in_ch), time_embed_dim),
        mlp_w2=u(ks[2], (in_ch, in_ch), in_ch),
        mlp_b2=u(ks[3], (1, in_ch), in_ch),
        conv1_w=u(ks[4], (3, 3, in_ch, out_ch), 9 * in_ch),
        conv1_b=u(ks[5], (1, out_ch), 9 * in_ch),
        bn1_gamma=jnp.ones((1, out_ch), jnp.float32),
        bn1_beta=jnp.zeros((1, out_ch), jnp.float32),
        conv2_w=u(ks[6], (3, 3, out_ch, out_ch), 9 * out_ch),
        conv2_b=u(ks[7], (1, out_ch), 9 * out_ch),
        bn2_gamma=jnp.ones((1, out_ch), jnp.float32),
        bn2_beta=jnp.zeros((1, out_ch), jnp.float32),
    )


# ------------------------------ JAX reference --------------------------------

def ref_forward(x_nchw, t_emb, p):
    hp = lax.Precision.HIGHEST
    t = jnp.maximum(jnp.dot(t_emb, p["mlp_w1"], precision=hp) + p["mlp_b1"], 0.0)
    t = jnp.dot(t, p["mlp_w2"], precision=hp) + p["mlp_b2"]
    x = x_nchw + t[:, :, None, None]

    def conv_bn_relu(x, w, b, gamma, beta):
        y = lax.conv_general_dilated(
            x, w, (1, 1), "SAME",
            dimension_numbers=("NCHW", "HWIO", "NCHW"),
            precision=hp) + b.reshape(1, -1, 1, 1)
        mean = y.mean(axis=(0, 2, 3), keepdims=True)
        var = ((y - mean) ** 2).mean(axis=(0, 2, 3), keepdims=True)
        y = (y - mean) * lax.rsqrt(var + BN_EPS)
        y = y * gamma.reshape(1, -1, 1, 1) + beta.reshape(1, -1, 1, 1)
        return jnp.maximum(y, 0.0)

    y = conv_bn_relu(x, p["conv1_w"], p["conv1_b"], p["bn1_gamma"], p["bn1_beta"])
    y = conv_bn_relu(y, p["conv2_w"], p["conv2_b"], p["bn2_gamma"], p["bn2_beta"])
    return y


# ---------------------------------- main -------------------------------------

if __name__ == "__main__":
    N, in_ch, out_ch, time_embed_dim, H, W = 2, 4, 8, 32, 16, 16

    key = jax.random.PRNGKey(0)
    kx, kt, kp = jax.random.split(key, 3)
    x = jax.random.normal(kx, (N, in_ch, H, W), jnp.float32)       # NCHW like PyTorch
    t_emb = jax.random.normal(kt, (N, time_embed_dim), jnp.float32)
    params = init_params(kp, in_ch, out_ch, time_embed_dim)

    y = jax.block_until_ready(conv_block_forward(x, t_emb, params))
    assert y.shape == (N, out_ch, H, W), y.shape

    y_ref = ref_forward(x, t_emb, params)
    if not jnp.allclose(y, y_ref, rtol=1e-3, atol=1e-3):
        max_err = float(jnp.max(jnp.abs(y - y_ref)))
        raise AssertionError(f"mismatch vs JAX reference, max abs err {max_err}")

    print("KERNEL_OK")
</pallas_src>

<mosaic_0001>
module attributes {stable_mosaic.version = 11 : i64} {
  func.func @fused_convblock_kernel(%arg0: i32, %arg1: memref<32x64xf32, #tpu.memory_space<vmem>>, %arg2: memref<2x32xf32, #tpu.memory_space<vmem>>, %arg3: memref<32x2xf32, #tpu.memory_space<vmem>>, %arg4: memref<32x4xf32, #tpu.memory_space<vmem>>, %arg5: memref<1x4xf32, #tpu.memory_space<vmem>>, %arg6: memref<4x64xf32, #tpu.memory_space<vmem>>, %arg7: memref<1x64xf32, #tpu.memory_space<vmem>>, %arg8: memref<32x32xf32, #tpu.memory_space<vmem>>, %arg9: memref<32x32xf32, #tpu.memory_space<vmem>>, %arg10: memref<3x64x128xf32, #tpu.memory_space<vmem>>, %arg11: memref<1x128xf32, #tpu.memory_space<vmem>>, %arg12: memref<1x128xf32, #tpu.memory_space<vmem>>, %arg13: memref<1x128xf32, #tpu.memory_space<vmem>>, %arg14: memref<3x128x128xf32, #tpu.memory_space<vmem>>, %arg15: memref<1x128xf32, #tpu.memory_space<vmem>>, %arg16: memref<1x128xf32, #tpu.memory_space<vmem>>, %arg17: memref<1x128xf32, #tpu.memory_space<vmem>>, %arg18: memref<128x128xf32, #tpu.memory_space<vmem>>, %arg19: memref<32x128xf32, #tpu.memory_space<vmem>>) attributes {dimension_semantics = [#tpu.dimension_semantics<arbitrary>], iteration_bounds = array<i64: 1>, scalar_prefetch = 0 : i64, scratch_operands = 0 : i64, tpu.core_type = #tpu.core_type<tc>, window_params = [{pipeline_mode = #tpu.pipeline_mode<synchronous>, transform_indices = @transform_0, window_bounds = array<i64: 32, 64>}, {pipeline_mode = #tpu.pipeline_mode<synchronous>, transform_indices = @transform_1, window_bounds = array<i64: 2, 32>}, {pipeline_mode = #tpu.pipeline_mode<synchronous>, transform_indices = @transform_2, window_bounds = array<i64: 32, 2>}, {pipeline_mode = #tpu.pipeline_mode<synchronous>, transform_indices = @transform_3, window_bounds = array<i64: 32, 4>}, {pipeline_mode = #tpu.pipeline_mode<synchronous>, transform_indices = @transform_4, window_bounds = array<i64: 1, 4>}, {pipeline_mode = #tpu.pipeline_mode<synchronous>, transform_indices = @transform_5, window_bounds = array<i64: 4, 64>}, {pipeline_mode = #tpu.pipeline_mode<synchronous>, transform_indices = @transform_6, window_bounds = array<i64: 1, 64>}, {pipeline_mode = #tpu.pipeline_mode<synchronous>, transform_indices = @transform_7, window_bounds = array<i64: 32, 32>}, {pipeline_mode = #tpu.pipeline_mode<synchronous>, transform_indices = @transform_8, window_bounds = array<i64: 32, 32>}, {pipeline_mode = #tpu.pipeline_mode<synchronous>, transform_indices = @transform_9, window_bounds = array<i64: 3, 64, 128>}, {pipeline_mode = #tpu.pipeline_mode<synchronous>, transform_indices = @transform_10, window_bounds = array<i64: 1, 128>}, {pipeline_mode = #tpu.pipeline_mode<synchronous>, transform_indices = @transform_11, window_bounds = array<i64: 1, 128>}, {pipeline_mode = #tpu.pipeline_mode<synchronous>, transform_indices = @transform_12, window_bounds = array<i64: 1, 128>}, {pipeline_mode = #tpu.pipeline_mode<synchronous>, transform_indices = @transform_13, window_bounds = array<i64: 3, 128, 128>}, {pipeline_mode = #tpu.pipeline_mode<synchronous>, transform_indices = @transform_14, window_bounds = array<i64: 1, 128>}, {pipeline_mode = #tpu.pipeline_mode<synchronous>, transform_indices = @transform_15, window_bounds = array<i64: 1, 128>}, {pipeline_mode = #tpu.pipeline_mode<synchronous>, transform_indices = @transform_16, window_bounds = array<i64: 1, 128>}, {pipeline_mode = #tpu.pipeline_mode<synchronous>, transform_indices = @transform_17, window_bounds = array<i64: 128, 128>}, {pipeline_mode = #tpu.pipeline_mode<synchronous>, transform_indices = @transform_18, window_bounds = array<i64: 32, 128>}]} {
    %c0 = arith.constant 0 : index
    %c0_0 = arith.constant 0 : index
    %0 = vector.load %arg2[%c0, %c0_0] : memref<2x32xf32, #tpu.memory_space<vmem>>, vector<2x32xf32>
    %c0_1 = arith.constant 0 : index
    %c0_2 = arith.constant 0 : index
    %1 = vector.load %arg4[%c0_1, %c0_2] : memref<32x4xf32, #tpu.memory_space<vmem>>, vector<32x4xf32>
    %cst = arith.constant dense<0.000000e+00> : vector<2x4xf32>
    %2 = tpu.matmul %0, %1, %cst {dimension_numbers = #tpu.dot_dimension_numbers<[1], [0], [0], [1], [0, 0, 1, 1], [], []>} : vector<2x32xf32>, vector<32x4xf32>, vector<2x4xf32> -> vector<2x4xf32>
    %c0_3 = arith.constant 0 : index
    %c0_4 = arith.constant 0 : index
    %3 = vector.load %arg5[%c0_3, %c0_4] : memref<1x4xf32, #tpu.memory_space<vmem>>, vector<1x4xf32>
    %4 = vector.broadcast %3 : vector<1x4xf32> to vector<2x4xf32>
    %5 = arith.addf %2, %4 : vector<2x4xf32>
    %cst_5 = arith.constant 0.000000e+00 : f32
    %6 = vector.broadcast %cst_5 : f32 to vector<2x4xf32>
    %7 = arith.maximumf %5, %6 : vector<2x4xf32>
    %c0_6 = arith.constant 0 : index
    %c0_7 = arith.constant 0 : index
    %8 = vector.load %arg6[%c0_6, %c0_7] : memref<4x64xf32, #tpu.memory_space<vmem>>, vector<4x64xf32>
    %cst_8 = arith.constant dense<0.000000e+00> : vector<2x64xf32>
    %9 = tpu.matmul %7, %8, %cst_8 {dimension_numbers = #tpu.dot_dimension_numbers<[1], [0], [0], [1], [0, 0, 1, 1], [], []>} : vector<2x4xf32>, vector<4x64xf32>, vector<2x64xf32> -> vector<2x64xf32>
    %c0_9 = arith.constant 0 : index
    %c0_10 = arith.constant 0 : index
    %10 = vector.load %arg7[%c0_9, %c0_10] : memref<1x64xf32, #tpu.memory_space<vmem>>, vector<1x64xf32>
    %11 = vector.broadcast %10 : vector<1x64xf32> to vector<2x64xf32>
    %12 = arith.addf %9, %11 : vector<2x64xf32>
    %c0_11 = arith.constant 0 : index
    %c0_12 = arith.constant 0 : index
    %13 = vector.load %arg1[%c0_11, %c0_12] : memref<32x64xf32, #tpu.memory_space<vmem>>, vector<32x64xf32>
    %c0_13 = arith.constant 0 : index
    %c0_14 = arith.constant 0 : index
    %14 = vector.load %arg3[%c0_13, %c0_14] : memref<32x2xf32, #tpu.memory_space<vmem>>, vector<32x2xf32>
    %cst_15 = arith.constant dense<0.000000e+00> : vector<32x64xf32>
    %15 = tpu.matmul %14, %12, %cst_15 {dimension_numbers = #tpu.dot_dimension_numbers<[1], [0], [0], [1], [0, 0, 1, 1], [], []>} : vector<32x2xf32>, vector<2x64xf32>, vector<32x64xf32> -> vector<32x64xf32>
    %16 = arith.addf %13, %15 : vector<32x64xf32>
    %c0_16 = arith.constant 0 : index
    %c0_17 = arith.constant 0 : index
    %17 = vector.load %arg11[%c0_16, %c0_17] : memref<1x128xf32, #tpu.memory_space<vmem>>, vector<1x128xf32>
    %c0_18 = arith.constant 0 : index
    %c0_19 = arith.constant 0 : index
    %18 = vector.load %arg8[%c0_18, %c0_19] : memref<32x32xf32, #tpu.memory_space<vmem>>, vector<32x32xf32>
    %cst_20 = arith.constant dense<0.000000e+00> : vector<32x64xf32>
    %19 = tpu.matmul %18, %16, %cst_20 {dimension_numbers = #tpu.dot_dimension_numbers<[1], [0], [0], [1], [0, 0, 1, 1], [], []>} : vector<32x32xf32>, vector<32x64xf32>, vector<32x64xf32> -> vector<32x64xf32>
    %c0_21 = arith.constant 0 : index
    %c0_22 = arith.constant 0 : index
    %20 = vector.load %arg9[%c0_21, %c0_22] : memref<32x32xf32, #tpu.memory_space<vmem>>, vector<32x32xf32>
    %cst_23 = arith.constant dense<0.000000e+00> : vector<32x64xf32>
    %21 = tpu.matmul %20, %16, %cst_23 {dimension_numbers = #tpu.dot_dimension_numbers<[1], [0], [0], [1], [0, 0, 1, 1], [], []>} : vector<32x32xf32>, vector<32x64xf32>, vector<32x64xf32> -> vector<32x64xf32>
    %c1 = arith.constant 1 : index
    %c0_24 = arith.constant 0 : index
    %c0_25 = arith.constant 0 : index
    %22 = vector.load %arg10[%c1, %c0_24, %c0_25] : memref<3x64x128xf32, #tpu.memory_space<vmem>>, vector<1x64x128xf32>
    %23 = vector.shape_cast %22 : vector<1x64x128xf32> to vector<64x128xf32>
    %cst_26 = arith.constant dense<0.000000e+00> : vector<32x128xf32>
    %24 = tpu.matmul %16, %23, %cst_26 {dimension_numbers = #tpu.dot_dimension_numbers<[1], [0], [0], [1], [0, 0, 1, 1], [], []>} : vector<32x64xf32>, vector<64x128xf32>, vector<32x128xf32> -> vector<32x128xf32>
    %c0_27 = arith.constant 0 : index
    %c0_28 = arith.constant 0 : index
    %c0_29 = arith.constant 0 : index
    %25 = vector.load %arg10[%c0_27, %c0_28, %c0_29] : memref<3x64x128xf32, #tpu.memory_space<vmem>>, vector<1x64x128xf32>
    %26 = vector.shape_cast %25 : vector<1x64x128xf32> to vector<64x128xf32>
    %cst_30 = arith.constant dense<0.000000e+00> : vector<32x128xf32>
    %27 = tpu.matmul %19, %26, %cst_30 {dimension_numbers = #tpu.dot_dimension_numbers<[1], [0], [0], [1], [0, 0, 1, 1], [], []>} : vector<32x64xf32>, vector<64x128xf32>, vector<32x128xf32> -> vector<32x128xf32>
    %28 = arith.addf %24, %27 : vector<32x128xf32>
    %c2 = arith.constant 2 : index
    %c0_31 = arith.constant 0 : index
    %c0_32 = arith.constant 0 : index
    %29 = vector.load %arg10[%c2, %c0_31, %c0_32] : memref<3x64x128xf32, #tpu.memory_space<vmem>>, vector<1x64x128xf32>
    %30 = vector.shape_cast %29 : vector<1x64x128xf32> to vector<64x128xf32>
    %cst_33 = arith.constant dense<0.000000e+00> : vector<32x128xf32>
    %31 = tpu.matmul %21, %30, %cst_33 {dimension_numbers = #tpu.dot_dimension_numbers<[1], [0], [0], [1], [0, 0, 1, 1], [], []>} : vector<32x64xf32>, vector<64x128xf32>, vector<32x128xf32> -> vector<32x128xf32>
    %32 = arith.addf %28, %31 : vector<32x128xf32>
    %33 = vector.broadcast %17 : vector<1x128xf32> to vector<32x128xf32>
    %34 = arith.addf %32, %33 : vector<32x128xf32>
    %c0_34 = arith.constant 0 : index
    %c0_35 = arith.constant 0 : index
    %35 = vector.load %arg12[%c0_34, %c0_35] : memref<1x128xf32, #tpu.memory_space<vmem>>, vector<1x128xf32>
    %c0_36 = arith.constant 0 : index
    %c0_37 = arith.constant 0 : index
    %36 = vector.load %arg13[%c0_36, %c0_37] : memref<1x128xf32, #tpu.memory_space<vmem>>, vector<1x128xf32>
    %cst_38 = arith.constant dense<0.000000e+00> : vector<128xf32>
    %37 = vector.multi_reduction <add>, %34, %cst_38 [0] : vector<32x128xf32> to vector<128xf32>
    %38 = vector.shape_cast %37 : vector<128xf32> to vector<1x128xf32>
    %cst_39 = arith.constant 3.200000e+01 : f32
    %39 = vector.broadcast %cst_39 : f32 to vector<1x128xf32>
    %40 = arith.divf %38, %39 : vector<1x128xf32>
    %c0_40 = arith.constant 0 : index
    %c0_41 = arith.constant 0 : index
    %41 = vector.load %arg18[%c0_40, %c0_41] : memref<128x128xf32, #tpu.memory_space<vmem>>, vector<128x128xf32>
    %cst_42 = arith.constant dense<0.000000e+00> : vector<1x128xf32>
    %42 = tpu.matmul %40, %41, %cst_42 {dimension_numbers = #tpu.dot_dimension_numbers<[1], [0], [0], [1], [0, 0, 1, 1], [], []>} : vector<1x128xf32>, vector<128x128xf32>, vector<1x128xf32> -> vector<1x128xf32>
    %43 = vector.broadcast %42 : vector<1x128xf32> to vector<32x128xf32>
    %44 = arith.subf %34, %43 : vector<32x128xf32>
    %45 = arith.mulf %44, %44 : vector<32x128xf32>
    %cst_43 = arith.constant dense<0.000000e+00> : vector<128xf32>
    %46 = vector.multi_reduction <add>, %45, %cst_43 [0] : vector<32x128xf32> to vector<128xf32>
    %47 = vector.shape_cast %46 : vector<128xf32> to vector<1x128xf32>
    %cst_44 = arith.constant 3.200000e+01 : f32
    %48 = vector.broadcast %cst_44 : f32 to vector<1x128xf32>
    %49 = arith.divf %47, %48 : vector<1x128xf32>
    %c0_45 = arith.constant 0 : index
    %c0_46 = arith.constant 0 : index
    %50 = vector.load %arg18[%c0_45, %c0_46] : memref<128x128xf32, #tpu.memory_space<vmem>>, vector<128x128xf32>
    %cst_47 = arith.constant dense<0.000000e+00> : vector<1x128xf32>
    %51 = tpu.matmul %49, %50, %cst_47 {dimension_numbers = #tpu.dot_dimension_numbers<[1], [0], [0], [1], [0, 0, 1, 1], [], []>} : vector<1x128xf32>, vector<128x128xf32>, vector<1x128xf32> -> vector<1x128xf32>
    %cst_48 = arith.constant 9.99999974E-6 : f32
    %52 = vector.broadcast %cst_48 : f32 to vector<1x128xf32>
    %53 = arith.addf %51, %52 : vector<1x128xf32>
    %54 = math.rsqrt %53 : vector<1x128xf32>
    %55 = arith.mulf %35, %54 : vector<1x128xf32>
    %56 = vector.broadcast %55 : vector<1x128xf32> to vector<32x128xf32>
    %57 = arith.mulf %44, %56 : vector<32x128xf32>
    %58 = vector.broadcast %36 : vector<1x128xf32> to vector<32x128xf32>
    %59 = arith.addf %57, %58 : vector<32x128xf32>
    %cst_49 = arith.constant 0.000000e+00 : f32
    %60 = vector.broadcast %cst_49 : f32 to vector<32x128xf32>
    %61 = arith.maximumf %59, %60 : vector<32x128xf32>
    %c0_50 = arith.constant 0 : index
    %c0_51 = arith.constant 0 : index
    %62 = vector.load %arg15[%c0_50, %c0_51] : memref<1x128xf32, #tpu.memory_space<vmem>>, vector<1x128xf32>
    %c0_52 = arith.constant 0 : index
    %c0_53 = arith.constant 0 : index
    %63 = vector.load %arg8[%c0_52, %c0_53] : memref<32x32xf32, #tpu.memory_space<vmem>>, vector<32x32xf32>
    %cst_54 = arith.constant dense<0.000000e+00> : vector<32x128xf32>
    %64 = tpu.matmul %63, %61, %cst_54 {dimension_numbers = #tpu.dot_dimension_numbers<[1], [0], [0], [1], [0, 0, 1, 1], [], []>} : vector<32x32xf32>, vector<32x128xf32>, vector<32x128xf32> -> vector<32x128xf32>
    %c0_55 = arith.constant 0 : index
    %c0_56 = arith.constant 0 : index
    %65 = vector.load %arg9[%c0_55, %c0_56] : memref<32x32xf32, #tpu.memory_space<vmem>>, vector<32x32xf32>
    %cst_57 = arith.constant dense<0.000000e+00> : vector<32x128xf32>
    %66 = tpu.matmul %65, %61, %cst_57 {dimension_numbers = #tpu.dot_dimension_numbers<[1], [0], [0], [1], [0, 0, 1, 1], [], []>} : vector<32x32xf32>, vector<32x128xf32>, vector<32x128xf32> -> vector<32x128xf32>
    %c1_58 = arith.constant 1 : index
    %c0_59 = arith.constant 0 : index
    %c0_60 = arith.constant 0 : index
    %67 = vector.load %arg14[%c1_58, %c0_59, %c0_60] : memref<3x128x128xf32, #tpu.memory_space<vmem>>, vector<1x128x128xf32>
    %68 = vector.shape_cast %67 : vector<1x128x128xf32> to vector<128x128xf32>
    %cst_61 = arith.constant dense<0.000000e+00> : vector<32x128xf32>
    %69 = tpu.matmul %61, %68, %cst_61 {dimension_numbers = #tpu.dot_dimension_numbers<[1], [0], [0], [1], [0, 0, 1, 1], [], []>} : vector<32x128xf32>, vector<128x128xf32>, vector<32x128xf32> -> vector<32x128xf32>
    %c0_62 = arith.constant 0 : index
    %c0_63 = arith.constant 0 : index
    %c0_64 = arith.constant 0 : index
    %70 = vector.load %arg14[%c0_62, %c0_63, %c0_64] : memref<3x128x128xf32, #tpu.memory_space<vmem>>, vector<1x128x128xf32>
    %71 = vector.shape_cast %70 : vector<1x128x128xf32> to vector<128x128xf32>
    %cst_65 = arith.constant dense<0.000000e+00> : vector<32x128xf32>
    %72 = tpu.matmul %64, %71, %cst_65 {dimension_numbers = #tpu.dot_dimension_numbers<[1], [0], [0], [1], [0, 0, 1, 1], [], []>} : vector<32x128xf32>, vector<128x128xf32>, vector<32x128xf32> -> vector<32x128xf32>
    %73 = arith.addf %69, %72 : vector<32x128xf32>
    %c2_66 = arith.constant 2 : index
    %c0_67 = arith.constant 0 : index
    %c0_68 = arith.constant 0 : index
    %74 = vector.load %arg14[%c2_66, %c0_67, %c0_68] : memref<3x128x128xf32, #tpu.memory_space<vmem>>, vector<1x128x128xf32>
    %75 = vector.shape_cast %74 : vector<1x128x128xf32> to vector<128x128xf32>
    %cst_69 = arith.constant dense<0.000000e+00> : vector<32x128xf32>
    %76 = tpu.matmul %66, %75, %cst_69 {dimension_numbers = #tpu.dot_dimension_numbers<[1], [0], [0], [1], [0, 0, 1, 1], [], []>} : vector<32x128xf32>, vector<128x128xf32>, vector<32x128xf32> -> vector<32x128xf32>
    %77 = arith.addf %73, %76 : vector<32x128xf32>
    %78 = vector.broadcast %62 : vector<1x128xf32> to vector<32x128xf32>
    %79 = arith.addf %77, %78 : vector<32x128xf32>
    %c0_70 = arith.constant 0 : index
    %c0_71 = arith.constant 0 : index
    %80 = vector.load %arg16[%c0_70, %c0_71] : memref<1x128xf32, #tpu.memory_space<vmem>>, vector<1x128xf32>
    %c0_72 = arith.constant 0 : index
    %c0_73 = arith.constant 0 : index
    %81 = vector.load %arg17[%c0_72, %c0_73] : memref<1x128xf32, #tpu.memory_space<vmem>>, vector<1x128xf32>
    %cst_74 = arith.constant dense<0.000000e+00> : vector<128xf32>
    %82 = vector.multi_reduction <add>, %79, %cst_74 [0] : vector<32x128xf32> to vector<128xf32>
    %83 = vector.shape_cast %82 : vector<128xf32> to vector<1x128xf32>
    %cst_75 = arith.constant 3.200000e+01 : f32
    %84 = vector.broadcast %cst_75 : f32 to vector<1x128xf32>
    %85 = arith.divf %83, %84 : vector<1x128xf32>
    %c0_76 = arith.constant 0 : index
    %c0_77 = arith.constant 0 : index
    %86 = vector.load %arg18[%c0_76, %c0_77] : memref<128x128xf32, #tpu.memory_space<vmem>>, vector<128x128xf32>
    %cst_78 = arith.constant dense<0.000000e+00> : vector<1x128xf32>
    %87 = tpu.matmul %85, %86, %cst_78 {dimension_numbers = #tpu.dot_dimension_numbers<[1], [0], [0], [1], [0, 0, 1, 1], [], []>} : vector<1x128xf32>, vector<128x128xf32>, vector<1x128xf32> -> vector<1x128xf32>
    %88 = vector.broadcast %87 : vector<1x128xf32> to vector<32x128xf32>
    %89 = arith.subf %79, %88 : vector<32x128xf32>
    %90 = arith.mulf %89, %89 : vector<32x128xf32>
    %cst_79 = arith.constant dense<0.000000e+00> : vector<128xf32>
    %91 = vector.multi_reduction <add>, %90, %cst_79 [0] : vector<32x128xf32> to vector<128xf32>
    %92 = vector.shape_cast %91 : vector<128xf32> to vector<1x128xf32>
    %cst_80 = arith.constant 3.200000e+01 : f32
    %93 = vector.broadcast %cst_80 : f32 to vector<1x128xf32>
    %94 = arith.divf %92, %93 : vector<1x128xf32>
    %c0_81 = arith.constant 0 : index
    %c0_82 = arith.constant 0 : index
    %95 = vector.load %arg18[%c0_81, %c0_82] : memref<128x128xf32, #tpu.memory_space<vmem>>, vector<128x128xf32>
    %cst_83 = arith.constant dense<0.000000e+00> : vector<1x128xf32>
    %96 = tpu.matmul %94, %95, %cst_83 {dimension_numbers = #tpu.dot_dimension_numbers<[1], [0], [0], [1], [0, 0, 1, 1], [], []>} : vector<1x128xf32>, vector<128x128xf32>, vector<1x128xf32> -> vector<1x128xf32>
    %cst_84 = arith.constant 9.99999974E-6 : f32
    %97 = vector.broadcast %cst_84 : f32 to vector<1x128xf32>
    %98 = arith.addf %96, %97 : vector<1x128xf32>
    %99 = math.rsqrt %98 : vector<1x128xf32>
    %100 = arith.mulf %80, %99 : vector<1x128xf32>
    %101 = vector.broadcast %100 : vector<1x128xf32> to vector<32x128xf32>
    %102 = arith.mulf %89, %101 : vector<32x128xf32>
    %103 = vector.broadcast %81 : vector<1x128xf32> to vector<32x128xf32>
    %104 = arith.addf %102, %103 : vector<32x128xf32>
    %cst_85 = arith.constant 0.000000e+00 : f32
    %105 = vector.broadcast %cst_85 : f32 to vector<32x128xf32>
    %106 = arith.maximumf %104, %105 : vector<32x128xf32>
    %c0_86 = arith.constant 0 : index
    %c0_87 = arith.constant 0 : index
    %107 = vector.load %arg19[%c0_86, %c0_87] : memref<32x128xf32, #tpu.memory_space<vmem>>, vector<32x128xf32>
    tpu.vector_store %arg19[%c0_86, %c0_87], %106 {strides = array<i32>} : memref<32x128xf32, #tpu.memory_space<vmem>>, vector<32x128xf32>,
    return
  }
  func.func @transform_0(%arg0: i32) -> (i32, i32) {
    %c0_i32 = arith.constant 0 : i32
    %c0_i32_0 = arith.constant 0 : i32
    %c0_i32_1 = arith.constant 0 : i32
    return %c0_i32, %c0_i32_0 : i32, i32
  }
  func.func @transform_1(%arg0: i32) -> (i32, i32) {
    %c0_i32 = arith.constant 0 : i32
    %c0_i32_0 = arith.constant 0 : i32
    %c0_i32_1 = arith.constant 0 : i32
    return %c0_i32, %c0_i32_0 : i32, i32
  }
  func.func @transform_2(%arg0: i32) -> (i32, i32) {
    %c0_i32 = arith.constant 0 : i32
    %c0_i32_0 = arith.constant 0 : i32
    %c0_i32_1 = arith.constant 0 : i32
    return %c0_i32, %c0_i32_0 : i32, i32
  }
  func.func @transform_3(%arg0: i32) -> (i32, i32) {
    %c0_i32 = arith.constant 0 : i32
    %c0_i32_0 = arith.constant 0 : i32
    %c0_i32_1 = arith.constant 0 : i32
    return %c0_i32, %c0_i32_0 : i32, i32
  }
  func.func @transform_4(%arg0: i32) -> (i32, i32) {
    %c0_i32 = arith.constant 0 : i32
    %c0_i32_0 = arith.constant 0 : i32
    %c0_i32_1 = arith.constant 0 : i32
    return %c0_i32, %c0_i32_0 : i32, i32
  }
  func.func @transform_5(%arg0: i32) -> (i32, i32) {
    %c0_i32 = arith.constant 0 : i32
    %c0_i32_0 = arith.constant 0 : i32
    %c0_i32_1 = arith.constant 0 : i32
    return %c0_i32, %c0_i32_0 : i32, i32
  }
  func.func @transform_6(%arg0: i32) -> (i32, i32) {
    %c0_i32 = arith.constant 0 : i32
    %c0_i32_0 = arith.constant 0 : i32
    %c0_i32_1 = arith.constant 0 : i32
    return %c0_i32, %c0_i32_0 : i32, i32
  }
  func.func @transform_7(%arg0: i32) -> (i32, i32) {
    %c0_i32 = arith.constant 0 : i32
    %c0_i32_0 = arith.constant 0 : i32
    %c0_i32_1 = arith.constant 0 : i32
    return %c0_i32, %c0_i32_0 : i32, i32
  }
  func.func @transform_8(%arg0: i32) -> (i32, i32) {
    %c0_i32 = arith.constant 0 : i32
    %c0_i32_0 = arith.constant 0 : i32
    %c0_i32_1 = arith.constant 0 : i32
    return %c0_i32, %c0_i32_0 : i32, i32
  }
  func.func @transform_9(%arg0: i32) -> (i32, i32, i32) {
    %c0_i32 = arith.constant 0 : i32
    %c0_i32_0 = arith.constant 0 : i32
    %c0_i32_1 = arith.constant 0 : i32
    %c0_i32_2 = arith.constant 0 : i32
    return %c0_i32, %c0_i32_0, %c0_i32_1 : i32, i32, i32
  }
  func.func @transform_10(%arg0: i32) -> (i32, i32) {
    %c0_i32 = arith.constant 0 : i32
    %c0_i32_0 = arith.constant 0 : i32
    %c0_i32_1 = arith.constant 0 : i32
    return %c0_i32, %c0_i32_0 : i32, i32
  }
  func.func @transform_11(%arg0: i32) -> (i32, i32) {
    %c0_i32 = arith.constant 0 : i32
    %c0_i32_0 = arith.constant 0 : i32
    %c0_i32_1 = arith.constant 0 : i32
    return %c0_i32, %c0_i32_0 : i32, i32
  }
  func.func @transform_12(%arg0: i32) -> (i32, i32) {
    %c0_i32 = arith.constant 0 : i32
    %c0_i32_0 = arith.constant 0 : i32
    %c0_i32_1 = arith.constant 0 : i32
    return %c0_i32, %c0_i32_0 : i32, i32
  }
  func.func @transform_13(%arg0: i32) -> (i32, i32, i32) {
    %c0_i32 = arith.constant 0 : i32
    %c0_i32_0 = arith.constant 0 : i32
    %c0_i32_1 = arith.constant 0 : i32
    %c0_i32_2 = arith.constant 0 : i32
    return %c0_i32, %c0_i32_0, %c0_i32_1 : i32, i32, i32
  }
  func.func @transform_14(%arg0: i32) -> (i32, i32) {
    %c0_i32 = arith.constant 0 : i32
    %c0_i32_0 = arith.constant 0 : i32
    %c0_i32_1 = arith.constant 0 : i32
    return %c0_i32, %c0_i32_0 : i32, i32
  }
  func.func @transform_15(%arg0: i32) -> (i32, i32) {
    %c0_i32 = arith.constant 0 : i32
    %c0_i32_0 = arith.constant 0 : i32
    %c0_i32_1 = arith.constant 0 : i32
    return %c0_i32, %c0_i32_0 : i32, i32
  }
  func.func @transform_16(%arg0: i32) -> (i32, i32) {
    %c0_i32 = arith.constant 0 : i32
    %c0_i32_0 = arith.constant 0 : i32
    %c0_i32_1 = arith.constant 0 : i32
    return %c0_i32, %c0_i32_0 : i32, i32
  }
  func.func @transform_17(%arg0: i32) -> (i32, i32) {
    %c0_i32 = arith.constant 0 : i32
    %c0_i32_0 = arith.constant 0 : i32
    %c0_i32_1 = arith.constant 0 : i32
    return %c0_i32, %c0_i32_0 : i32, i32
  }
  func.func @transform_18(%arg0: i32) -> (i32, i32) {
    %c0_i32 = arith.constant 0 : i32
    %c0_i32_0 = arith.constant 0 : i32
    %c0_i32_1 = arith.constant 0 : i32
    return %c0_i32, %c0_i32_0 : i32, i32
  }
}

</mosaic_0001>

<bundles_post_ra>
// kernel: tpu_custom_call.1
= control target key start
LH: loop header
LB: loop body
LE: loop exit
PB: predicated region body
PF: predicated region fallthrough
CT: control target
= control target key end

     0   :  { %s3856_s0 = inlined_call_operand.hbm [shape: f32[32,64], index: 0, kind: input, shape index: {}]   ;;  %s3857_s1 = inlined_call_operand.vmem [shape: f32[2,32], index: 1, kind: input, shape index: {}]   ;;  %s3858_s2 = inlined_call_operand.vmem [shape: f32[32,2], index: 2, kind: input, shape index: {}]   ;;  %s3859_s3 = inlined_call_operand.vmem [shape: f32[32,4], index: 3, kind: input, shape index: {}]   ;;  %s3860_s4 = inlined_call_operand.hbm [shape: f32[1,4], index: 4, kind: input, shape index: {}]   ;;  %s3861_s5 = inlined_call_operand.vmem [shape: f32[4,64], index: 5, kind: input, shape index: {}]   ;;  %s3862_s6 = inlined_call_operand.hbm [shape: f32[1,64], index: 6, kind: input, shape index: {}]   ;;  %s3863_s7 = inlined_call_operand.hbm [shape: f32[32,32], index: 7, kind: input, shape index: {}]   ;;  %s3864_s8 = inlined_call_operand.hbm [shape: f32[32,32], index: 8, kind: input, shape index: {}]   ;;  %s3865_s9 = inlined_call_operand.hbm [shape: f32[3,64,128], index: 9, kind: input, shape index: {}]   ;;  %s3866_s10 = inlined_call_operand.hbm [shape: f32[1,128], index: 10, kind: input, shape index: {}]   ;;  %s3867_s11 = inlined_call_operand.hbm [shape: f32[1,128], index: 11, kind: input, shape index: {}]   ;;  %s3868_s12 = inlined_call_operand.hbm [shape: f32[1,128], index: 12, kind: input, shape index: {}]   ;;  %s3869_s13 = inlined_call_operand.hbm [shape: f32[3,128,128], index: 13, kind: input, shape index: {}]   ;;  %s3870_s14 = inlined_call_operand.hbm [shape: f32[1,128], index: 14, kind: input, shape index: {}]   ;;  %s3871_s15 = inlined_call_operand.hbm [shape: f32[1,128], index: 15, kind: input, shape index: {}]   ;;  %s3872_s16 = inlined_call_operand.hbm [shape: f32[1,128], index: 16, kind: input, shape index: {}]   ;;  %s3873_s17 = inlined_call_operand.vmem [shape: f32[128,128], index: 17, kind: input, shape index: {}]   ;;  %s3874_s18 = inlined_call_operand.hbm [shape: f32[32,128], index: 18, kind: output, shape index: {}]  }
   0x1   :  { %3877 = sst [smem:[#allocation32_spill]] %s3856_s0 }
   0x2   :  { %3878 = sst [smem:[#allocation33_spill]] %s3857_s1 }
   0x3   :  { %3879 = sst [smem:[#allocation34_spill]] %s3858_s2 }
   0x4   :  { %23 = vsyncpa [#allocation3], 0 }
   0x5   :  { %24 = vsyncpa [#allocation6], 0 }
   0x6   :  { %25 = vsyncpa [#allocation9], 0 }
   0x7   :  { %26 = vsyncpa [#allocation12], 0 }
   0x8   :  { %27 = vsyncpa [#allocation15], 0 }
   0x9   :  { %28 = vsyncpa [#allocation18], 0 }
   0xa   :  { %29 = vsyncpa [#allocation21], 0 }
   0xb   :  { %30 = vsyncpa [#allocation4], 0  ;;  %s3267_s27 = smov [#allocation5]   ;;  %s2943_s0 = scalar_lea.hbm %s3860_s4, 16 }
   0xc   :  { %s55_s28 = sshll.u32 %s3267_s27, 4  ;;  %p2944_p0 = scmp.ne.s32.totalorder %s3860_s4, %s2943_s0  ;;  %s56_s28 = int_to_ptr.vmem [resolvable:$true] %s55_s28 }
   0xd   :  { %p2947_p1 = scmp.lt.u32.totalorder %s2943_s0, %s3860_s4 }
   0xf   :  { %p2949_p2 = pnand %p2947_p1, %p2944_p0 }
  0x11   :  { %2952 = shalt.err (!%p2949_p2)
}
  0x12   :  { %s2953_s22 = scalar_lea.vmem %s56_s28, 16  ;;  %s2957_s2 = scalar_lea.vmem %s56_s28, 32 }
  0x13   :  { %p2954_p3 = scmp.ne.s32.totalorder %s56_s28, %s2953_s22  ;;  %p2958_p4 = scmp.lt.s32.totalorder %s56_s28, %s56_s28 }
  0x14   :  { %p2959_p5 = scmp.lt.s32.totalorder %s2957_s2, %s2953_s22 }
  0x16   :  { %p2960_p6 = por %p2959_p5, %p2958_p4 }
  0x18   :  { %p2961_p7 = pnand %p2960_p6, %p2954_p3 }
  0x1a   :  { %2964 = shalt.err (!%p2961_p7)
}
  0x1b   :  { %58 = dma.hbm_to_vmem [thread:$0]  %s3860_s4, 16, %s56_s28, [#allocation6]  }
  0x1c   :  { %s3268_s25 = smov [#allocation8]   ;;  %s3269_s27 = smov [#allocation11]  }
  0x1d   :  { %s76_s26 = sshll.u32 %s3268_s25, 4  ;;  %s100_s29 = sshll.u32 %s3269_s27, 4  ;;  %s77_s26 = int_to_ptr.vmem [resolvable:$true] %s76_s26  ;;  %s101_s29 = int_to_ptr.vmem [resolvable:$true] %s100_s29 }
  0x1e   :  { %s2965_s19 = scalar_lea.hbm %s3863_s7, 512 }
  0x1f   :  { %p2966_p8 = scmp.ne.s32.totalorder %s3863_s7, %s2965_s19  ;;  %p2969_p9 = scmp.lt.u32.totalorder %s2965_s19, %s3863_s7 }
  0x21   :  { %p2971_p10 = pnand %p2969_p9, %p2966_p8 }
  0x23   :  { %2974 = shalt.err (!%p2971_p10)
}
  0x24   :  { %s2975_s4 = scalar_lea.vmem %s77_s26, 512  ;;  %p2980_p12 = scmp.lt.s32.totalorder %s77_s26, %s77_s26 }
  0x25   :  { %p2976_p11 = scmp.ne.s32.totalorder %s77_s26, %s2975_s4  ;;  %p2981_p13 = scmp.lt.s32.totalorder %s2975_s4, %s2975_s4 }
  0x27   :  { %p2982_p0 = por %p2981_p13, %p2980_p12 }
  0x29   :  { %p2983_p1 = pnand %p2982_p0, %p2976_p11 }
  0x2b   :  { %2986 = shalt.err (!%p2983_p1)
}
  0x2c   :  { %s3270_s28 = smov 128   ;;  %s3271_s2 = smov 8  }
  0x2d   :  { %82 = dma.hbm_to_vmem [thread:$0]  %s3863_s7, 512, %s77_s26, [#allocation9], %s3270_s28, %s3270_s28, %s3271_s2  }
  0x2e   :  { %s2987_s30 = scalar_lea.hbm %s3865_s9, 3072 }
  0x2f   :  { %p2988_p2 = scmp.ne.s32.totalorder %s3865_s9, %s2987_s30  ;;  %p2991_p3 = scmp.lt.u32.totalorder %s2987_s30, %s3865_s9 }
  0x31   :  { %p2993_p4 = pnand %p2991_p3, %p2988_p2 }
  0x33   :  { %2996 = shalt.err (!%p2993_p4)
}
  0x34   :  { %s2997_s21 = scalar_lea.vmem %s101_s29, 3072  ;;  %p3002_p6 = scmp.lt.s32.totalorder %s101_s29, %s101_s29 }
  0x35   :  { %p2998_p5 = scmp.ne.s32.totalorder %s101_s29, %s2997_s21  ;;  %p3003_p7 = scmp.lt.s32.totalorder %s2997_s21, %s2997_s21 }
  0x37   :  { %p3004_p8 = por %p3003_p7, %p3002_p6 }
  0x39   :  { %p3005_p9 = pnand %p3004_p8, %p2998_p5 }
  0x3b   :  { %3008 = shalt.err (!%p3005_p9)
}
  0x3c   :  { %106 = dma.hbm_to_vmem [thread:$0]  %s3865_s9, 3072, %s101_s29, [#allocation12], %s3270_s28, %s3270_s28, %s3271_s2  }
  0x3d   :  { %s3272_s22 = smov [#allocation14]   ;;  %s3273_s23 = smov [#allocation17]  }
  0x3e   :  { %s123_s4 = sshll.u32 %s3272_s22, 4  ;;  %s142_s24 = sshll.u32 %s3273_s23, 4  ;;  %s124_s4 = int_to_ptr.vmem [resolvable:$true] %s123_s4  ;;  %s143_s24 = int_to_ptr.vmem [resolvable:$true] %s142_s24 }
  0x3f   :  { %s3009_s30 = scalar_lea.hbm %s3867_s11, 16 }
  0x40   :  { %p3010_p10 = scmp.ne.s32.totalorder %s3867_s11, %s3009_s30  ;;  %p3013_p11 = scmp.lt.u32.totalorder %s3009_s30, %s3867_s11 }
  0x42   :  { %p3015_p12 = pnand %p3013_p11, %p3010_p10 }
  0x44   :  { %3018 = shalt.err (!%p3015_p12)
}
  0x45   :  { %s3019_s9 = scalar_lea.vmem %s124_s4, 16  ;;  %s3023_s29 = scalar_lea.vmem %s124_s4, 32 }
  0x46   :  { %p3020_p13 = scmp.ne.s32.totalorder %s124_s4, %s3019_s9  ;;  %p3024_p0 = scmp.lt.s32.totalorder %s124_s4, %s124_s4 }
  0x47   :  { %p3025_p1 = scmp.lt.s32.totalorder %s3023_s29, %s3019_s9 }
  0x49   :  { %p3026_p2 = por %p3025_p1, %p3024_p0 }
  0x4b   :  { %p3027_p3 = pnand %p3026_p2, %p3020_p13 }
  0x4d   :  { %3030 = shalt.err (!%p3027_p3)
}
  0x4e   :  { %126 = dma.hbm_to_vmem [thread:$0]  %s3867_s11, 16, %s124_s4, [#allocation15]  }
  0x4f   :  { %s3031_s23 = scalar_lea.hbm %s3869_s13, 6144 }
  0x50   :  { %p3032_p4 = scmp.ne.s32.totalorder %s3869_s13, %s3031_s23  ;;  %p3035_p5 = scmp.lt.u32.totalorder %s3031_s23, %s3869_s13 }
  0x52   :  { %p3037_p6 = pnand %p3035_p5, %p3032_p4 }
  0x54   :  { %3040 = shalt.err (!%p3037_p6)
}
  0x55   :  { %s3041_s19 = scalar_lea.vmem %s143_s24, 6144  ;;  %p3046_p8 = scmp.lt.s32.totalorder %s143_s24, %s143_s24 }
  0x56   :  { %p3042_p7 = scmp.ne.s32.totalorder %s143_s24, %s3041_s19  ;;  %p3047_p9 = scmp.lt.s32.totalorder %s3041_s19, %s3041_s19 }
  0x58   :  { %p3048_p10 = por %p3047_p9, %p3046_p8 }
  0x5a   :  { %p3049_p11 = pnand %p3048_p10, %p3042_p7 }
  0x5c   :  { %3052 = shalt.err (!%p3049_p11)
}
  0x5d   :  { %148 = dma.hbm_to_vmem [thread:$0]  %s3869_s13, 6144, %s143_s24, [#allocation18], %s3270_s28, %s3270_s28, %s3271_s2  }
  0x5e   :  { %s3274_s1 = smov [#allocation20]   ;;  %s3275_s9 = smov [#allocation2]  }
  0x5f   :  { %s165_s20 = sshll.u32 %s3274_s1, 4  ;;  %s36_s29 = sshll.u32 %s3275_s9, 4  ;;  %s166_s20 = int_to_ptr.vmem [resolvable:$true] %s165_s20  ;;  %s37_s29 = int_to_ptr.vmem [resolvable:$true] %s36_s29 }
  0x60   :  { %s3053_s26 = scalar_lea.hbm %s3871_s15, 16 }
  0x61   :  { %p3054_p12 = scmp.ne.s32.totalorder %s3871_s15, %s3053_s26  ;;  %p3057_p13 = scmp.lt.u32.totalorder %s3053_s26, %s3871_s15 }
  0x63   :  { %p3059_p0 = pnand %p3057_p13, %p3054_p12 }
  0x65   :  { %3062 = shalt.err (!%p3059_p0)
}
  0x66   :  { %s3063_s13 = scalar_lea.vmem %s166_s20, 16  ;;  %s3067_s24 = scalar_lea.vmem %s166_s20, 32 }
  0x67   :  { %p3064_p1 = scmp.ne.s32.totalorder %s166_s20, %s3063_s13  ;;  %p3068_p2 = scmp.lt.s32.totalorder %s166_s20, %s166_s20 }
  0x68   :  { %p3069_p3 = scmp.lt.s32.totalorder %s3067_s24, %s3063_s13 }
  0x6a   :  { %p3070_p4 = por %p3069_p3, %p3068_p2 }
  0x6c   :  { %p3071_p5 = pnand %p3070_p4, %p3064_p1 }
  0x6e   :  { %3074 = shalt.err (!%p3071_p5)
}
  0x6f   :  { %168 = dma.hbm_to_vmem [thread:$0]  %s3871_s15, 16, %s166_s20, [#allocation21]  }
  0x70   :  { %s3880_s4 = sld [smem:[#allocation32_spill]] }
  0x76   :  { %s3075_s1 = scalar_lea.hbm %s3880_s4, 512 }
  0x77   :  { %p3076_p6 = scmp.ne.s32.totalorder %s3880_s4, %s3075_s1  ;;  %p3079_p7 = scmp.lt.u32.totalorder %s3075_s1, %s3880_s4 }
  0x79   :  { %p3081_p8 = pnand %p3079_p7, %p3076_p6 }
  0x7b   :  { %3084 = shalt.err (!%p3081_p8)
}
  0x7c   :  { %s3085_s22 = scalar_lea.vmem %s37_s29, 512  ;;  %p3090_p10 = scmp.lt.s32.totalorder %s37_s29, %s37_s29 }
  0x7d   :  { %p3086_p9 = scmp.ne.s32.totalorder %s37_s29, %s3085_s22  ;;  %p3091_p11 = scmp.lt.s32.totalorder %s3085_s22, %s3085_s22 }
  0x7f   :  { %p3092_p12 = por %p3091_p11, %p3090_p10 }
  0x81   :  { %p3093_p13 = pnand %p3092_p12, %p3086_p9 }
  0x83   :  { %3096 = shalt.err (!%p3093_p13)
}
  0x84   :  { %42 = dma.hbm_to_vmem [thread:$0]  %s3880_s4, 512, %s37_s29, [#allocation3], %s3270_s28, %s3270_s28, %s3271_s2  }
  0x85   :  { %s3276_s23 = smov [#allocation7]   ;;  %s3277_s27 = smov [#allocation10]  }
  0x86   :  { %s67_s25 = sshll.u32 %s3276_s23, 4  ;;  %s88_s13 = sshll.u32 %s3277_s27, 4  ;;  %s68_s25 = int_to_ptr.vmem [resolvable:$true] %s67_s25  ;;  %s89_s13 = int_to_ptr.vmem [resolvable:$true] %s88_s13 }
  0x87   :  { %s3097_s0 = scalar_lea.hbm %s3862_s6, 16 }
  0x88   :  { %p3098_p0 = scmp.ne.s32.totalorder %s3862_s6, %s3097_s0  ;;  %p3101_p1 = scmp.lt.u32.totalorder %s3097_s0, %s3862_s6 }
  0x8a   :  { %p3103_p2 = pnand %p3101_p1, %p3098_p0 }
  0x8c   :  { %3106 = shalt.err (!%p3103_p2)
}
  0x8d   :  { %s3107_s29 = scalar_lea.vmem %s68_s25, 16  ;;  %s3111_s4 = scalar_lea.vmem %s68_s25, 32 }
  0x8e   :  { %p3108_p3 = scmp.ne.s32.totalorder %s68_s25, %s3107_s29  ;;  %p3112_p4 = scmp.lt.s32.totalorder %s68_s25, %s68_s25 }
  0x8f   :  { %p3113_p5 = scmp.lt.s32.totalorder %s3111_s4, %s3107_s29 }
  0x91   :  { %p3114_p6 = por %p3113_p5, %p3112_p4 }
  0x93   :  { %p3115_p7 = pnand %p3114_p6, %p3108_p3 }
  0x95   :  { %3118 = shalt.err (!%p3115_p7)
}
  0x96   :  { %70 = dma.hbm_to_vmem [thread:$0]  %s3862_s6, 16, %s68_s25, [#allocation6]  }
  0x97   :  { %s3119_s15 = scalar_lea.hbm %s3864_s8, 512 }
  0x98   :  { %p3120_p8 = scmp.ne.s32.totalorder %s3864_s8, %s3119_s15  ;;  %p3123_p9 = scmp.lt.u32.totalorder %s3119_s15, %s3864_s8 }
  0x9a   :  { %p3125_p10 = pnand %p3123_p9, %p3120_p8 }
  0x9c   :  { %3128 = shalt.err (!%p3125_p10)
}
  0x9d   :  { %s3129_s30 = scalar_lea.vmem %s89_s13, 512  ;;  %p3134_p12 = scmp.lt.s32.totalorder %s89_s13, %s89_s13 }
  0x9e   :  { %p3130_p11 = scmp.ne.s32.totalorder %s89_s13, %s3129_s30  ;;  %p3135_p13 = scmp.lt.s32.totalorder %s3129_s30, %s3129_s30 }
  0xa0   :  { %p3136_p0 = por %p3135_p13, %p3134_p12 }
  0xa2   :  { %p3137_p1 = pnand %p3136_p0, %p3130_p11 }
  0xa4   :  { %3140 = shalt.err (!%p3137_p1)
}
  0xa5   :  { %94 = dma.hbm_to_vmem [thread:$0]  %s3864_s8, 512, %s89_s13, [#allocation9], %s3270_s28, %s3270_s28, %s3271_s2  }
  0xa6   :  { %s3278_s0 = smov [#allocation13]   ;;  %s3279_s11 = smov [#allocation16]  }
  0xa7   :  { %s113_s19 = sshll.u32 %s3278_s0, 4  ;;  %s133_s1 = sshll.u32 %s3279_s11, 4  ;;  %s114_s19 = int_to_ptr.vmem [resolvable:$true] %s113_s19  ;;  %s134_s1 = int_to_ptr.vmem [resolvable:$true] %s133_s1 }
  0xa8   :  { %s3141_s4 = scalar_lea.hbm %s3866_s10, 16 }
  0xa9   :  { %p3142_p2 = scmp.ne.s32.totalorder %s3866_s10, %s3141_s4  ;;  %p3145_p3 = scmp.lt.u32.totalorder %s3141_s4, %s3866_s10 }
  0xab   :  { %p3147_p4 = pnand %p3145_p3, %p3142_p2 }
  0xad   :  { %3150 = shalt.err (!%p3147_p4)
}
  0xae   :  { %s3151_s8 = scalar_lea.vmem %s114_s19, 16  ;;  %s3155_s13 = scalar_lea.vmem %s114_s19, 32 }
  0xaf   :  { %p3152_p5 = scmp.ne.s32.totalorder %s114_s19, %s3151_s8  ;;  %p3156_p6 = scmp.lt.s32.totalorder %s114_s19, %s114_s19 }
  0xb0   :  { %p3157_p7 = scmp.lt.s32.totalorder %s3155_s13, %s3151_s8 }
  0xb2   :  { %p3158_p8 = por %p3157_p7, %p3156_p6 }
  0xb4   :  { %p3159_p9 = pnand %p3158_p8, %p3152_p5 }
  0xb6   :  { %3162 = shalt.err (!%p3159_p9)
}
  0xb7   :  { %116 = dma.hbm_to_vmem [thread:$0]  %s3866_s10, 16, %s114_s19, [#allocation12]  }
  0xb8   :  { %s3163_s24 = scalar_lea.hbm %s3868_s12, 16 }
  0xb9   :  { %p3164_p10 = scmp.ne.s32.totalorder %s3868_s12, %s3163_s24  ;;  %p3167_p11 = scmp.lt.u32.totalorder %s3163_s24, %s3868_s12 }
  0xbb   :  { %p3169_p12 = pnand %p3167_p11, %p3164_p10 }
  0xbd   :  { %3172 = shalt.err (!%p3169_p12)
}
  0xbe   :  { %s3173_s11 = scalar_lea.vmem %s134_s1, 16  ;;  %s3177_s9 = scalar_lea.vmem %s134_s1, 32 }
  0xbf   :  { %p3174_p13 = scmp.ne.s32.totalorder %s134_s1, %s3173_s11  ;;  %p3178_p0 = scmp.lt.s32.totalorder %s134_s1, %s134_s1 }
  0xc0   :  { %p3179_p1 = scmp.lt.s32.totalorder %s3177_s9, %s3173_s11 }
  0xc2   :  { %p3180_p2 = por %p3179_p1, %p3178_p0 }
  0xc4   :  { %p3181_p3 = pnand %p3180_p2, %p3174_p13 }
  0xc6   :  { %3184 = shalt.err (!%p3181_p3)
}
  0xc7   :  { %136 = dma.hbm_to_vmem [thread:$0]  %s3868_s12, 16, %s134_s1, [#allocation15]  }
  0xc8   :  { %s3280_s29 = smov [#allocation19]   ;;  %s3281_s21 = smov [#allocation22]  }
  0xc9   :  { %s155_s4 = sshll.u32 %s3280_s29, 4  ;;  %s175_s7 = sshll.u32 %s3281_s21, 4  ;;  %s156_s4 = int_to_ptr.vmem [resolvable:$true] %s155_s4  ;;  %s176_s7 = int_to_ptr.vmem [resolvable:$true] %s175_s7 }
  0xca   :  { %s3185_s8 = scalar_lea.hbm %s3870_s14, 16 }
  0xcb   :  { %p3186_p4 = scmp.ne.s32.totalorder %s3870_s14, %s3185_s8  ;;  %p3189_p5 = scmp.lt.u32.totalorder %s3185_s8, %s3870_s14 }
  0xcd   :  { %p3191_p6 = pnand %p3189_p5, %p3186_p4 }
  0xcf   :  { %3194 = shalt.err (!%p3191_p6)
}
  0xd0   :  { %s3195_s12 = scalar_lea.vmem %s156_s4, 16  ;;  %s3199_s1 = scalar_lea.vmem %s156_s4, 32 }
  0xd1   :  { %p3196_p7 = scmp.ne.s32.totalorder %s156_s4, %s3195_s12  ;;  %p3200_p8 = scmp.lt.s32.totalorder %s156_s4, %s156_s4 }
  0xd2   :  { %p3201_p9 = scmp.lt.s32.totalorder %s3199_s1, %s3195_s12 }
  0xd4   :  { %p3202_p10 = por %p3201_p9, %p3200_p8 }
  0xd6   :  { %p3203_p11 = pnand %p3202_p10, %p3196_p7 }
  0xd8   :  { %3206 = shalt.err (!%p3203_p11)
}
  0xd9   :  { %158 = dma.hbm_to_vmem [thread:$0]  %s3870_s14, 16, %s156_s4, [#allocation18]  }
  0xda   :  { %s3207_s25 = scalar_lea.hbm %s3872_s16, 16 }
  0xdb   :  { %p3208_p12 = scmp.ne.s32.totalorder %s3872_s16, %s3207_s25  ;;  %p3211_p13 = scmp.lt.u32.totalorder %s3207_s25, %s3872_s16 }
  0xdd   :  { %p3213_p0 = pnand %p3211_p13, %p3208_p12 }
  0xdf   :  { %3216 = shalt.err (!%p3213_p0)
}
  0xe0   :  { %s3217_s19 = scalar_lea.vmem %s176_s7, 16  ;;  %s3221_s29 = scalar_lea.vmem %s176_s7, 32 }
  0xe1   :  { %p3218_p1 = scmp.ne.s32.totalorder %s176_s7, %s3217_s19  ;;  %p3222_p2 = scmp.lt.s32.totalorder %s176_s7, %s176_s7 }
  0xe2   :  { %p3223_p3 = scmp.lt.s32.totalorder %s3221_s29, %s3217_s19 }
  0xe4   :  { %p3224_p4 = por %p3223_p3, %p3222_p2 }
  0xe6   :  { %p3225_p5 = pnand %p3224_p4, %p3218_p1 }
  0xe8   :  { %3228 = shalt.err (!%p3225_p5)
}
  0xe9   :  { %178 = dma.hbm_to_vmem [thread:$0]  %s3872_s16, 16, %s176_s7, [#allocation21]  }
  0xea   :  { %3251 = dma.done.wait [#allocation3], 512  }
  0xeb   :  { %3252 = vsyncadd [#allocation3], 4294966784 }
  0xec   :  { %3253 = dma.done.wait [#allocation6], 32  }
  0xed   :  { %3254 = vsyncadd [#allocation6], 4294967264 }
  0xee   :  { %3255 = dma.done.wait [#allocation9], 1024  }
  0xef   :  { %3256 = vsyncadd [#allocation9], 4294966272 }
  0xf0   :  { %3257 = dma.done.wait [#allocation12], 3088  }
  0xf1   :  { %3258 = vsyncadd [#allocation12], 4294964208 }
  0xf2   :  { %3259 = dma.done.wait [#allocation15], 32  }
  0xf3   :  { %3260 = vsyncadd [#allocation15], 4294967264 }
  0xf4   :  { %3261 = dma.done.wait [#allocation18], 6160  }
  0xf5   :  { %3262 = vsyncadd [#allocation18], 4294961136 }
  0xf6   :  { %3263 = dma.done.wait [#allocation21], 32  }
  0xf7   :  { %3264 = vsyncadd [#allocation21], 4294967264  ;;  %v3282_v0 = vmov 0.0|0.0   ;;  %vm3283_vm0 = vmmov 0   ;;  %v3284_v1 = vmov 0.0   ;;  %v221_v2 = vld [vmem:[%s3859_s3] sm:$0xff] }
  0xf8   :  { %2626 = vmatprep.subr.bf16.mxu0 %v3282_v0  ;;  %2234 = vmatprep.mubr.msk.f32.mxu0 %vm3283_vm0, %v3284_v1  ;;  %v222_v3 = vld [vmem:[%s3859_s3 + $0x8] sm:$0xff]  ;;  %v223_v4 = vld [vmem:[%s3859_s3 + $0x10] sm:$0xff]  ;;  %v224_v6 = vld [vmem:[%s3859_s3 + $0x18] sm:$0xff]  ;;  %s3881_s12 = sld [smem:[#allocation33_spill]]  ;;  %vm232_vm1 = vcmask 261120   ;;  %vm319_vm2 = vcmask 1043456  }
  0xf9   :  { %2237 = vmatprep.subr.mxu1 %v3284_v1  ;;  %2239 = vmatprep.mubr.msk.f32.mxu1 %vm3283_vm0, %v3284_v1  ;;  %v2627_v5 = vpack.c.bf16 %v222_v3, %v221_v2  ;;  %v2630_v7 = vpack.c.bf16 %v224_v6, %v223_v4  ;;  %v307_v9 = vld [vmem:[%s3861_s5] sm:$0xf]  ;;  %vm315_vm3 = vcmask 31744   ;;  %s3882_s30 = sld [smem:[#allocation34_spill]]  ;;  %vm401_vm4 = vcmask 15360   ;;  %v3590_v23 = vld [vmem:[#allocation8] sm:$0xff] }
  0xfa   :  { %2238 = vmatpush3.msk.msra.mxu1 %vm319_vm2, %v307_v9  ;;  %v1976_v10 = vld [vmem:[#allocation5] ss:$0 sm:$0xff]  ;;  %v1978_v16 = vld [vmem:[#allocation7] ss:$0 sm:$0xff]  ;;  %vm414_vm5 = vcmask 1041408   ;;  %v3592_v24 = vld [vmem:[#allocation10] sm:$0xff] }
  0xfb   :  { %2628 = vmatpush3.bf16.msra.mxu0 %v2627_v5  ;;  %v394_v25 = vld [vmem:[#allocation2 + $0x8] sm:$0xff]  ;;  %v393_v26 = vld [vmem:[#allocation2] sm:$0xff]  ;;  %v396_v31 = vld [vmem:[#allocation2 + $0x18] sm:$0xff]  ;;  %vm727_vm6 = vcmask 523264  }
  0xfc   :  { %2629 = vmatprep.subr.bf16.mxu0 %v3282_v0  ;;  %v395_v32 = vld [vmem:[#allocation2 + $0x10] sm:$0xff]  ;;  %v711_v35 = vld [vmem:[#allocation11 + $0x40] sm:$0xff]  ;;  %v714_v46 = vld [vmem:[#allocation11 + $0x58] sm:$0xff] }
  0xfd   :  { %v712_v38 = vld [vmem:[#allocation11 + $0x48] sm:$0xff]  ;;  %v719_v39 = vld [vmem:[#allocation11] sm:$0xff]  ;;  %v713_v45 = vld [vmem:[#allocation11 + $0x50] sm:$0xff] }
  0xfe   :  { %v220_v8 = vld [vmem:[%s3881_s12] sm:$0x3]  ;;  %v720_v40 = vld [vmem:[#allocation11 + $0x8] sm:$0xff]  ;;  %v2664_v43 = vpack.c.bf16 %v712_v38, %v711_v35  ;;  %v3611_v49 = vld [vmem:[#allocation8 + $0x10] sm:$0xff]  ;;  %v2668_v51 = vpack.c.bf16 %v714_v46, %v713_v45 }
  0xff   :  { %2631 = vmatpush3.bf16.msra.mxu0 %v2630_v7  ;;  %v397_v15 = vld [vmem:[%s3882_s30] sm:$0xff]  ;;  %v398_v20 = vld [vmem:[%s3882_s30 + $0x8] sm:$0xff]  ;;  %v399_v21 = vld [vmem:[%s3882_s30 + $0x10] sm:$0xff]  ;;  %v2648_v44 = vpack.c.bf16 %v720_v40, %v719_v39 }
 0x100   :  { %v400_v22 = vld [vmem:[%s3882_s30 + $0x18] sm:$0xff]  ;;  %v3607_v47 = vld [vmem:[#allocation8 + $0x8] sm:$0xff]  ;;  %v715_v52 = vld [vmem:[#allocation11 + $0x60] sm:$0xff] }
 0x101   :  { %v3609_v48 = vld [vmem:[#allocation10 + $0x8] sm:$0xff]  ;;  %v3613_v50 = vld [vmem:[#allocation10 + $0x10] sm:$0xff]  ;;  %v722_v55 = vld [vmem:[#allocation11 + $0x18] sm:$0xff] }
 0x102   :  { %2235 = vmatmul.mubr.msk.f32.vlgmr.msra.gmra.mrb[0].mxu0 %vm232_vm1, %v220_v8  ;;  %v716_v53 = vld [vmem:[#allocation11 + $0x68] sm:$0xff]  ;;  %v721_v54 = vld [vmem:[#allocation11 + $0x10] sm:$0xff]  ;;  %v3619_v56 = vld [vmem:[#allocation8 + $0x18] sm:$0xff] }
 0x103   :  { %2272 = vmatprep.mubr.msk.f32.mxu0 %vm232_vm1, %v3592_v24  ;;  %v3623_v57 = vld [vmem:[#allocation10 + $0x18] sm:$0xff]  ;;  %v723_v58 = vld [vmem:[#allocation11 + $0x20] sm:$0xff]  ;;  %v724_v59 = vld [vmem:[#allocation11 + $0x28] sm:$0xff]  ;;  %v2672_v60 = vpack.c.bf16 %v716_v53, %v715_v52  ;;  %v2652_v61 = vpack.c.bf16 %v722_v55, %v721_v54 }
 0x104   :  { %v717_v62 = vld [vmem:[#allocation11 + $0x70] sm:$0xff]  ;;  %v718_v63 = vld [vmem:[#allocation11 + $0x78] sm:$0xff]  ;;  %v2656_v2 = vpack.c.bf16 %v724_v59, %v723_v58  ;;  %v923_v6 = vld [vmem:[#allocation11 + $0x80] sm:$0xff] }
 0x105   :  { %v725_v3 = vld [vmem:[#allocation11 + $0x30] sm:$0xff]  ;;  %v726_v4 = vld [vmem:[#allocation11 + $0x38] sm:$0xff]  ;;  %v2676_v5 = vpack.c.bf16 %v718_v63, %v717_v62  ;;  %v924_v7 = vld [vmem:[#allocation11 + $0x88] sm:$0xff] }
 0x106   :  { %v2660_v8 = vpack.c.bf16 %v726_v4, %v725_v3  ;;  %v2680_v9 = vpack.c.bf16 %v924_v7, %v923_v6  ;;  %v1059_v35 = vld [vmem:[%s3873_s17 + $0x20] sm:$0xff]  ;;  %v1062_v38 = vld [vmem:[%s3873_s17 + $0x38] sm:$0xff]  ;;  %v1069_v53 = vld [vmem:[%s3873_s17 + $0x70] sm:$0xff] }
 0x107   :  { %v1063_v40 = vld [vmem:[%s3873_s17 + $0x40] sm:$0xff]  ;;  %v1070_v54 = vld [vmem:[%s3873_s17 + $0x78] sm:$0xff] }
 0x108   :  { %v1067_v46 = vld [vmem:[%s3873_s17 + $0x60] sm:$0xff]  ;;  %v3727_v55 = vpack.c.bf16 %v1070_v54, %v1069_v53 }
 0x1d5   :  { %v302_v11 = vpop.f32.mrb[0].mxu0 }
 0x1d6   :  { %v303_v12 = vadd.f32 %v1976_v10, %v302_v11  ;;  %v2236_v13 = vpop.f32.mrb[1].mxu0  ;;  %v925_v10 = vld [vmem:[#allocation11 + $0x90] sm:$0xff]  ;;  %v926_v11 = vld [vmem:[#allocation11 + $0x98] sm:$0xff] }
 0x1d7   :  { %v927_v13 = vld [vmem:[#allocation11 + $0xa0] sm:$0xff] }
 0x1d8   :  { %v306_v14 = vmax.f32 %v303_v12, 0.0  ;;  %v2684_v12 = vpack.c.bf16 %v926_v11, %v925_v10 }
 0x1da   :  { %2240 = vmatmul.mubr.msk.f32.vlgmr.msra.gmra.mrb[0].mxu1 %vm315_vm3, %v306_v14  ;;  %v928_v14 = vld [vmem:[#allocation11 + $0xa8] sm:$0xff] }
 0x1db   :  { %2244 = vmatprep.mubr.msk.f32.mxu1 %vm401_vm4, %v397_v15  ;;  %v2688_v15 = vpack.c.bf16 %v928_v14, %v927_v13 }
 0x2ad   :  { %v389_v17 = vpop.f32.mrb[0].mxu1 }
 0x2ae   :  { %v390_v18 = vadd.f32 %v1978_v16, %v389_v17  ;;  %v2241_v19 = vpop.f32.mrb[1].mxu1  ;;  %v929_v16 = vld [vmem:[#allocation11 + $0xb0] sm:$0xff]  ;;  %v930_v17 = vld [vmem:[#allocation11 + $0xb8] sm:$0xff] }
 0x2af   :  { %v1055_v19 = vld [vmem:[%s3873_s17] sm:$0xff] }
 0x2b0   :  { %2242 = vmatprep.subr.msk.mxu1 %vm414_vm5, %v390_v18 }
 0x2b1   :  { %2243 = vmatpush3.msk.msra.mxu1 %vm414_vm5, %v390_v18  ;;  %v2692_v18 = vpack.c.bf16 %v930_v17, %v929_v16 }
 0x2b2   :  { %2245 = vmatmul.mubr.msk.f32.vlgmr.msra.gmra.mrb[2].mxu1 %vm401_vm4, %v398_v20  ;;  %v1056_v20 = vld [vmem:[%s3873_s17 + $0x8] sm:$0xff] }
 0x2b3   :  { %2247 = vmatprep.mubr.msk.f32.mxu1 %vm401_vm4, %v399_v21 }
 0x2b6   :  { %2248 = vmatmul.mubr.msk.f32.gmra.mrb[4].mxu1 %vm401_vm4, %v400_v22 }
 0x2b7   :  { %2258 = vmatprep.mubr.msk.f32.mxu1 %vm232_vm1, %v3590_v23 }
 0x385   :  { %v2246_v27 = vpop.f32.mrb[2].mxu1 }
 0x386   :  { %v3598_v28 = vadd.f32 %v2246_v27, %v394_v25  ;;  %v484_v29 = vpop.f32.mrb[3].mxu1  ;;  %v3645_v25 = vpack.c.bf16 %v1056_v20, %v1055_v19 }
 0x387   :  { %v503_v30 = vadd.f32 %v484_v29, %v393_v26 }
 0x389   :  { %v2632_v33 = vpack.c.bf16 %v3598_v28, %v503_v30  ;;  %v2249_v34 = vpop.f32.mrb[4].mxu1 }
 0x38a   :  { %v3601_v36 = vadd.f32 %v2249_v34, %v396_v31  ;;  %v494_v37 = vpop.f32.mrb[5].mxu1 }
 0x38b   :  { %v3603_v41 = vadd.f32 %v494_v37, %v395_v32  ;;  %2633 = vmatprep.subr.bf16.mxu1 %v2632_v33  ;;  %2641 = vmatprep.subr.bf16.mxu0 %v2632_v33  ;;  %v1057_v32 = vld [vmem:[%s3873_s17 + $0x10] sm:$0xff] }
 0x38c   :  { %2635 = vmatpush3.bf16.msra.mxu1 %v2632_v33  ;;  %2643 = vmatpush3.bf16.msra.mxu0 %v2632_v33  ;;  %v1058_v33 = vld [vmem:[%s3873_s17 + $0x18] sm:$0xff]  ;;  %v1061_v37 = vld [vmem:[%s3873_s17 + $0x30] sm:$0xff] }
 0x38d   :  { %v2636_v42 = vpack.c.bf16 %v3601_v36, %v3603_v41  ;;  %v3667_v34 = vpack.c.bf16 %v1058_v33, %v1057_v32  ;;  %v3687_v39 = vpack.c.bf16 %v1062_v38, %v1061_v37 }
 0x38f   :  { %2637 = vmatprep.subr.bf16.mxu1 %v2636_v42  ;;  %2645 = vmatprep.subr.bf16.mxu0 %v2636_v42 }
 0x390   :  { %2639 = vmatpush3.bf16.msra.mxu1 %v2636_v42  ;;  %2647 = vmatpush3.bf16.msra.mxu0 %v2636_v42 }
 0x391   :  { %2665 = vmatprep.subr.bf16.mxu1 %v2664_v43  ;;  %2649 = vmatprep.subr.bf16.mxu0 %v2648_v44 }
 0x393   :  { %2259 = vmatmul.mubr.msk.f32.vlgmr.msra.gmra.mrb[6].mxu1 %vm232_vm1, %v3607_v47  ;;  %2273 = vmatmul.mubr.msk.f32.vlgmr.msra.gmra.mrb[2].mxu0 %vm232_vm1, %v3609_v48 }
 0x394   :  { %2667 = vmatpush3.bf16.msra.mxu1 %v2664_v43  ;;  %2261 = vmatprep.mubr.msk.f32.mxu1 %vm232_vm1, %v3611_v49  ;;  %v1065_v43 = vld [vmem:[%s3873_s17 + $0x50] sm:$0xff] }
 0x395   :  { %2275 = vmatprep.mubr.msk.f32.mxu0 %vm232_vm1, %v3613_v50  ;;  %2669 = vmatprep.subr.bf16.mxu1 %v2668_v51 }
 0x396   :  { %2651 = vmatpush3.bf16.msra.mxu0 %v2648_v44  ;;  %v1066_v44 = vld [vmem:[%s3873_s17 + $0x58] sm:$0xff] }
 0x397   :  { %2262 = vmatmul.mubr.msk.f32.gmra.mrb[8].mxu1 %vm232_vm1, %v3619_v56  ;;  %2276 = vmatmul.mubr.msk.f32.gmra.mrb[4].mxu0 %vm232_vm1, %v3623_v57  ;;  %v3707_v45 = vpack.c.bf16 %v1066_v44, %v1065_v43 }
 0x398   :  { %2671 = vmatpush3.bf16.msra.mxu1 %v2668_v51  ;;  %2316 = vmatprep.mubr.msk.f32.mxu1 %vm727_vm6, %v503_v30  ;;  %v1068_v51 = vld [vmem:[%s3873_s17 + $0x68] sm:$0xff] }
 0x399   :  { %2673 = vmatprep.subr.bf16.mxu1 %v2672_v60  ;;  %2653 = vmatprep.subr.bf16.mxu0 %v2652_v61  ;;  %v3717_v52 = vpack.c.bf16 %v1068_v51, %v1067_v46 }
 0x39a   :  { %2655 = vmatpush3.bf16.msra.mxu0 %v2652_v61 }
 0x39b   :  { %2657 = vmatprep.subr.bf16.mxu0 %v2656_v2 }
 0x39c   :  { %2675 = vmatpush3.bf16.msra.mxu1 %v2672_v60  ;;  %v2006_v60 = vld [vmem:[#allocation13] ss:$0 sm:$0xff] }
 0x39d   :  { %2677 = vmatprep.subr.bf16.mxu1 %v2676_v5 }
 0x39e   :  { %2659 = vmatpush3.bf16.msra.mxu0 %v2656_v2 }
 0x39f   :  { %2661 = vmatprep.subr.bf16.mxu0 %v2660_v8 }
 0x3a0   :  { %2679 = vmatpush3.bf16.msra.mxu1 %v2676_v5 }
 0x3a1   :  { %2681 = vmatprep.subr.bf16.mxu1 %v2680_v9 }
 0x3a2   :  { %2663 = vmatpush3.bf16.msra.mxu0 %v2660_v8 }
 0x3a3   :  { %2317 = vmatmul.mubr.msk.f32.vlgmr.msra.gmra.mrb[10].mxu1 %vm727_vm6, %v3598_v28  ;;  %2696 = vmatprep.subr.bf16.mxu0 %v3282_v0 }
 0x3a4   :  { %2319 = vmatprep.mubr.msk.f32.mxu1 %vm727_vm6, %v3603_v41  ;;  %2683 = vmatpush3.bf16.msra.mxu1 %v2680_v9  ;;  %v1064_v41 = vld [vmem:[%s3873_s17 + $0x48] sm:$0xff] }
 0x3a5   :  { %2685 = vmatprep.subr.bf16.mxu1 %v2684_v12  ;;  %v3697_v42 = vpack.c.bf16 %v1064_v41, %v1063_v40 }
 0x3a7   :  { %2320 = vmatmul.mubr.msk.f32.gmra.mrb[12].mxu1 %vm727_vm6, %v3601_v36 }
 0x3a8   :  { %2687 = vmatpush3.bf16.msra.mxu1 %v2684_v12 }
 0x3a9   :  { %2689 = vmatprep.subr.bf16.mxu1 %v2688_v15 }
 0x3ac   :  { %2691 = vmatpush3.bf16.msra.mxu1 %v2688_v15 }
 0x3ad   :  { %2693 = vmatprep.subr.bf16.mxu1 %v2692_v18 }
 0x3b0   :  { %2695 = vmatpush3.bf16.msra.mxu1 %v2692_v18 }
 0x466   :  { %v2260_v21 = vpop.f32.mrb[6].mxu1  ;;  %v2274_v22 = vpop.f32.mrb[2].mxu0 }
 0x467   :  { %v590_v26 = vpop.f32.mrb[7].mxu1  ;;  %v691_v27 = vpop.f32.mrb[3].mxu0 }
 0x468   :  { %2294 = vmatprep.mubr.msk.f32.mxu0 %vm727_vm6, %v590_v26  ;;  %2338 = vmatprep.mubr.msk.f32.mxu1 %vm727_vm6, %v691_v27  ;;  %v1141_v26 = vlaneseq }
 0x469   :  { %2295 = vmatmul.mubr.msk.f32.vlgmr.msra.gmra.mrb[6].mxu0 %vm727_vm6, %v2260_v21  ;;  %2339 = vmatmul.mubr.msk.f32.vlgmr.msra.gmra.mrb[10].mxu1 %vm727_vm6, %v2274_v22 }
 0x46a   :  { %v2263_v28 = vpop.f32.mrb[8].mxu1  ;;  %v2277_v29 = vpop.f32.mrb[4].mxu0  ;;  %2698 = vmatpush3.bf16.msra.mxu0 %v3645_v25  ;;  %v1142_v27 = vshrl.u32 %v1141_v26, 7  ;;  %v1448_v26 = vld [vmem:[#allocation17 + $0x8] sm:$0xff] }
 0x46b   :  { %v600_v30 = vpop.f32.mrb[9].mxu1  ;;  %v701_v31 = vpop.f32.mrb[5].mxu0  ;;  %2699 = vmatprep.subr.bf16.mxu0 %v3282_v0 }
 0x46c   :  { %2297 = vmatprep.mubr.msk.f32.mxu0 %vm727_vm6, %v600_v30  ;;  %2341 = vmatprep.mubr.msk.f32.mxu1 %vm727_vm6, %v701_v31 }
 0x46d   :  { %2298 = vmatmul.mubr.msk.f32.gmra.mrb[8].mxu0 %vm727_vm6, %v2263_v28  ;;  %2342 = vmatmul.mubr.msk.f32.gmra.mrb[12].mxu1 %vm727_vm6, %v2277_v29  ;;  %v3749_v28 = vsub.s32 0, %v1142_v27 }
 0x46e   :  { %2376 = vmatprep.mubr.msk.f32.mxu0 %vm3283_vm0, %v3284_v1  ;;  %2422 = vmatprep.mubr.msk.f32.mxu1 %vm232_vm1, %v3590_v23  ;;  %v1060_v23 = vld [vmem:[%s3873_s17 + $0x28] sm:$0xff]  ;;  %s3285_s17 = smov [#allocation23]  }
 0x46f   :  { %2701 = vmatpush3.bf16.msra.mxu0 %v3667_v34  ;;  %v3677_v36 = vpack.c.bf16 %v1060_v23, %v1059_v35  ;;  %s1958_s16 = sshll.u32 %s3285_s17, 4  ;;  %s1959_s16 = int_to_ptr.vmem [resolvable:$true] %s1958_s16 }
 0x470   :  { %2702 = vmatprep.subr.bf16.mxu0 %v3282_v0  ;;  %s3229_s21 = scalar_lea.vmem %s1959_s16, 512  ;;  %p3234_p7 = scmp.lt.s32.totalorder %s1959_s16, %s1959_s16 }
 0x471   :  { %p3230_p6 = scmp.ne.s32.totalorder %s1959_s16, %s3229_s21  ;;  %p3235_p8 = scmp.lt.s32.totalorder %s3229_s21, %s3229_s21 }
 0x473   :  { %2704 = vmatpush3.bf16.msra.mxu0 %v3677_v36  ;;  %p3236_p9 = por %p3235_p8, %p3234_p7 }
 0x474   :  { %2705 = vmatprep.subr.bf16.mxu0 %v3282_v0 }
 0x475   :  { %p3237_p10 = pnand %p3236_p9, %p3230_p6 }
 0x477   :  { %2707 = vmatpush3.bf16.msra.mxu0 %v3687_v39 }
 0x478   :  { %2708 = vmatprep.subr.bf16.mxu0 %v3282_v0 }
 0x47b   :  { %2710 = vmatpush3.bf16.msra.mxu0 %v3697_v42 }
 0x47c   :  { %2711 = vmatprep.subr.bf16.mxu0 %v3282_v0 }
 0x47f   :  { %2713 = vmatpush3.bf16.msra.mxu0 %v3707_v45 }
 0x480   :  { %2714 = vmatprep.subr.bf16.mxu0 %v3282_v0 }
 0x483   :  { %2716 = vmatpush3.bf16.msra.mxu0 %v3717_v52 }
 0x484   :  { %2717 = vmatprep.subr.bf16.mxu0 %v3282_v0 }
 0x487   :  { %2719 = vmatpush3.bf16.msra.mxu0 %v3727_v55 }
 0x488   :  { %2720 = vmatprep.subr.bf16.mxu0 %v3282_v0 }
 0x53c   :  { %v2296_v58 = vpop.f32.mrb[6].mxu0  ;;  %v2340_v59 = vpop.f32.mrb[10].mxu1 }
 0x53d   :  { %v2904_v61 = vadd.f32 %v2340_v59, %v2296_v58  ;;  %v806_v62 = vpop.f32.mrb[7].mxu0  ;;  %v1009_v63 = vpop.f32.mrb[11].mxu1 }
 0x53e   :  { %v2905_v2 = vadd.f32 %v1009_v63, %v806_v62 }
 0x53f   :  { %v1039_v3 = vadd.f32 %v2904_v61, %v2006_v60 }
 0x540   :  { %v1038_v4 = vadd.f32 %v2905_v2, %v2006_v60  ;;  %v2299_v5 = vpop.f32.mrb[8].mxu0  ;;  %v2343_v6 = vpop.f32.mrb[12].mxu1 }
 0x541   :  { %v2906_v7 = vadd.f32 %v2343_v6, %v2299_v5  ;;  %v816_v8 = vpop.f32.mrb[9].mxu0  ;;  %v1019_v9 = vpop.f32.mrb[13].mxu1 }
 0x542   :  { %v2907_v10 = vadd.f32 %v1019_v9, %v816_v8  ;;  %v1044_v11 = vadd.f32 %v1039_v3, %v1038_v4 }
 0x543   :  { %v1041_v13 = vadd.f32 %v2906_v7, %v2006_v60  ;;  %v2007_v7 = vld [vmem:[#allocation16] ss:$0 sm:$0xff] }
 0x544   :  { %v1040_v12 = vadd.f32 %v2907_v10, %v2006_v60 }
 0x546   :  { %v1045_v14 = vadd.f32 %v1044_v11, %v1040_v12 }
 0x548   :  { %v1046_v15 = vadd.f32 %v1045_v14, %v1041_v13 }
 0x54a   :  { %v1047_v16 = vrot.slane %v1046_v15, 4 }
 0x54c   :  { %v1048_v17 = vadd.f32 %v1047_v16, %v1046_v15 }
 0x54e   :  { %v1049_v18 = vrot.slane %v1048_v17, 2 }
 0x550   :  { %v1050_v19 = vadd.f32 %v1049_v18, %v1048_v17 }
 0x552   :  { %v1051_v20 = vrot.slane %v1050_v19, 1 }
 0x554   :  { %v1052_v21 = vadd.f32 %v1051_v20, %v1050_v19 }
 0x556   :  { %v1054_v22 = vmul.f32 0.03125, %v1052_v21 }
 0x558   :  { %2377 = vmatmul.mubr.f32.vlgmr.msra.gmra.mrb[10].mxu0 %v1054_v22  ;;  %v1447_v22 = vld [vmem:[#allocation17] sm:$0xff] }
 0x559   :  { %2722 = vmatpush3.bf16.msra.mxu0 %v3645_v25  ;;  %2411 = vmatprep.mubr.msk.f32.mxu0 %vm3283_vm0, %v3284_v1  ;;  %v2760_v27 = vpack.c.bf16 %v1448_v26, %v1447_v22 }
 0x55a   :  { %2723 = vmatprep.subr.bf16.mxu0 %v3282_v0 }
 0x55d   :  { %2725 = vmatpush3.bf16.msra.mxu0 %v3667_v34 }
 0x55e   :  { %2726 = vmatprep.subr.bf16.mxu0 %v3282_v0 }
 0x561   :  { %2728 = vmatpush3.bf16.msra.mxu0 %v3677_v36 }
 0x562   :  { %2729 = vmatprep.subr.bf16.mxu0 %v3282_v0 }
 0x565   :  { %2731 = vmatpush3.bf16.msra.mxu0 %v3687_v39 }
 0x566   :  { %2732 = vmatprep.subr.bf16.mxu0 %v3282_v0 }
 0x569   :  { %2734 = vmatpush3.bf16.msra.mxu0 %v3697_v42 }
 0x56a   :  { %2735 = vmatprep.subr.bf16.mxu0 %v3282_v0 }
 0x56d   :  { %2737 = vmatpush3.bf16.msra.mxu0 %v3707_v45 }
 0x56e   :  { %2738 = vmatprep.subr.bf16.mxu0 %v3282_v0 }
 0x571   :  { %2740 = vmatpush3.bf16.msra.mxu0 %v3717_v52 }
 0x572   :  { %2741 = vmatprep.subr.bf16.mxu0 %v3282_v0 }
 0x575   :  { %2743 = vmatpush3.bf16.msra.mxu0 %v3727_v55 }
 0x576   :  { %2856 = vmatprep.subr.bf16.mxu0 %v3282_v0 }
 0x62b   :  { %v1137_v29 = vpop.f32.mrb[10].mxu0 }
 0x62c   :  { %v1144_v30 = vrot.slane %v1137_v29, %v3749_v28  ;;  %v2378_v31 = vpop.f32.mrb[11].mxu0  ;;  %v1449_v29 = vld [vmem:[#allocation17 + $0x10] sm:$0xff] }
 0x62e   :  { %v1145_v32 = vsub.f32 %v1038_v4, %v1144_v30  ;;  %v1146_v33 = vsub.f32 %v1039_v3, %v1144_v30  ;;  %v1147_v35 = vsub.f32 %v1040_v12, %v1144_v30  ;;  %v1148_v23 = vsub.f32 %v1041_v13, %v1144_v30  ;;  %v1042_v3 = vld [vmem:[#allocation14] sm:$0x1] }
 0x62f   :  { %v1450_v30 = vld [vmem:[#allocation17 + $0x18] sm:$0xff] }
 0x630   :  { %v1149_v37 = vmul.f32 %v1145_v32, %v1145_v32  ;;  %v1150_v38 = vmul.f32 %v1146_v33, %v1146_v33  ;;  %v1151_v40 = vmul.f32 %v1147_v35, %v1147_v35  ;;  %v1152_v43 = vmul.f32 %v1148_v23, %v1148_v23 }
 0x631   :  { %v2764_v31 = vpack.c.bf16 %v1450_v30, %v1449_v29  ;;  %v1442_v29 = vld [vmem:[#allocation17 + $0xd8] sm:$0xff]  ;;  %v1444_v30 = vld [vmem:[#allocation17 + $0xe8] sm:$0xff] }
 0x632   :  { %v1153_v41 = vadd.f32 %v1150_v38, %v1149_v37  ;;  %v1458_v38 = vld [vmem:[#allocation17 + $0x58] sm:$0xff] }
 0x634   :  { %v1154_v44 = vadd.f32 %v1153_v41, %v1151_v40  ;;  %v1459_v40 = vld [vmem:[#allocation17 + $0x60] sm:$0xff]  ;;  %v1460_v41 = vld [vmem:[#allocation17 + $0x68] sm:$0xff] }
 0x636   :  { %v1155_v46 = vadd.f32 %v1154_v44, %v1152_v43  ;;  %v2784_v43 = vpack.c.bf16 %v1460_v41, %v1459_v40  ;;  %v1461_v44 = vld [vmem:[#allocation17 + $0x70] sm:$0xff]  ;;  %v1641_v41 = vld [vmem:[#allocation17 + $0x138] sm:$0xff] }
 0x637   :  { %v1640_v40 = vld [vmem:[#allocation17 + $0x130] sm:$0xff] }
 0x638   :  { %v1156_v51 = vrot.slane %v1155_v46, 4 }
 0x63a   :  { %v1157_v53 = vadd.f32 %v1156_v51, %v1155_v46  ;;  %v1431_v51 = vld [vmem:[#allocation17 + $0x80] sm:$0xff] }
 0x63c   :  { %v1158_v54 = vrot.slane %v1157_v53, 2 }
 0x63e   :  { %v1159_v58 = vadd.f32 %v1158_v54, %v1157_v53  ;;  %v1432_v53 = vld [vmem:[#allocation17 + $0x88] sm:$0xff] }
 0x63f   :  { %v2792_v54 = vpack.c.bf16 %v1432_v53, %v1431_v51  ;;  %v1647_v51 = vld [vmem:[#allocation17 + $0x168] sm:$0xff]  ;;  %v1649_v53 = vld [vmem:[#allocation17 + $0x178] sm:$0xff] }
 0x640   :  { %v1160_v59 = vrot.slane %v1159_v58, 1 }
 0x642   :  { %v1161_v60 = vadd.f32 %v1160_v59, %v1159_v58  ;;  %v1433_v58 = vld [vmem:[#allocation17 + $0x90] sm:$0xff]  ;;  %v1434_v59 = vld [vmem:[#allocation17 + $0x98] sm:$0xff] }
 0x644   :  { %v1162_v61 = vmul.f32 0.03125, %v1161_v60 }
 0x646   :  { %2412 = vmatmul.mubr.f32.vlgmr.msra.gmra.mrb[12].mxu0 %v1162_v61 }
 0x647   :  { %2858 = vmatpush3.bf16.msra.mxu0 %v3645_v25  ;;  %2588 = vmatprep.mubr.msk.f32.mxu0 %vm3283_vm0, %v3284_v1 }
 0x648   :  { %2859 = vmatprep.subr.bf16.mxu0 %v3282_v0 }
 0x64b   :  { %2861 = vmatpush3.bf16.msra.mxu0 %v3667_v34 }
 0x64c   :  { %2862 = vmatprep.subr.bf16.mxu0 %v3282_v0 }
 0x64f   :  { %2864 = vmatpush3.bf16.msra.mxu0 %v3677_v36 }
 0x650   :  { %2865 = vmatprep.subr.bf16.mxu0 %v3282_v0 }
 0x653   :  { %2867 = vmatpush3.bf16.msra.mxu0 %v3687_v39 }
 0x654   :  { %2868 = vmatprep.subr.bf16.mxu0 %v3282_v0 }
 0x657   :  { %2870 = vmatpush3.bf16.msra.mxu0 %v3697_v42 }
 0x658   :  { %2871 = vmatprep.subr.bf16.mxu0 %v3282_v0 }
 0x65b   :  { %2873 = vmatpush3.bf16.msra.mxu0 %v3707_v45 }
 0x65c   :  { %2874 = vmatprep.subr.bf16.mxu0 %v3282_v0 }
 0x65f   :  { %2876 = vmatpush3.bf16.msra.mxu0 %v3717_v52 }
 0x660   :  { %2877 = vmatprep.subr.bf16.mxu0 %v3282_v0 }
 0x663   :  { %2879 = vmatpush3.bf16.msra.mxu0 %v3727_v55 }
 0x664   :  { %2880 = vmatprep.subr.bf16.mxu0 %v3282_v0 }
 0x719   :  { %v1229_v62 = vpop.f32.mrb[12].mxu0 }
 0x71a   :  { %v1230_v63 = vadd.f32 1e-05, %v1229_v62  ;;  %v2413_v2 = vpop.f32.mrb[13].mxu0  ;;  %v2796_v62 = vpack.c.bf16 %v1434_v59, %v1433_v58  ;;  %v2016_v58 = vld [vmem:[#allocation19] ss:$0 sm:$0xff] }
 0x71b   :  { %v1436_v2 = vld [vmem:[#allocation17 + $0xa8] sm:$0xff] }
 0x71c   :  { %2939 = vrsqrt.f32 %v1230_v63  ;;  %v1435_v63 = vld [vmem:[#allocation17 + $0xa0] sm:$0xff] }
 0x726   :  { %v2940_v4 = vpop.eup %2939 }
 0x727   :  { %v1234_v5 = vmul.f32 %v2940_v4, %v1042_v3 }
 0x729   :  { %v1239_v6 = vrot.slane %v1234_v5, %v3749_v28  ;;  %v2800_v5 = vpack.c.bf16 %v1436_v2, %v1435_v63 }
 0x72b   :  { %v1241_v8 = vmul.f32 %v1239_v6, %v1145_v32  ;;  %v1242_v9 = vmul.f32 %v1239_v6, %v1146_v33  ;;  %v1243_v10 = vmul.f32 %v1239_v6, %v1147_v35  ;;  %v1244_v11 = vmul.f32 %v1239_v6, %v1148_v23  ;;  %v1451_v32 = vld [vmem:[#allocation17 + $0x20] sm:$0xff]  ;;  %v1452_v33 = vld [vmem:[#allocation17 + $0x28] sm:$0xff]  ;;  %v1454_v35 = vld [vmem:[#allocation17 + $0x38] sm:$0xff] }
 0x72c   :  { %v1456_v23 = vld [vmem:[#allocation17 + $0x48] sm:$0xff]  ;;  %v1437_v6 = vld [vmem:[#allocation17 + $0xb0] sm:$0xff] }
 0x72d   :  { %v3771_v12 = vadd.f32 %v2007_v7, %v1241_v8  ;;  %v3773_v13 = vadd.f32 %v2007_v7, %v1242_v9  ;;  %v3775_v14 = vadd.f32 %v2007_v7, %v1243_v10  ;;  %v3777_v15 = vadd.f32 %v2007_v7, %v1244_v11  ;;  %v1438_v7 = vld [vmem:[#allocation17 + $0xb8] sm:$0xff]  ;;  %v1439_v11 = vld [vmem:[#allocation17 + $0xc0] sm:$0xff] }
 0x72e   :  { %v2804_v9 = vpack.c.bf16 %v1438_v7, %v1437_v6 }
 0x72f   :  { %v1255_v16 = vmax.f32 %v3771_v12, 0.0  ;;  %v1256_v17 = vmax.f32 %v3773_v13, 0.0  ;;  %v1257_v18 = vmax.f32 %v3775_v14, 0.0  ;;  %v1258_v19 = vmax.f32 %v3777_v15, 0.0  ;;  %v1645_v14 = vld [vmem:[#allocation17 + $0x158] sm:$0xff] }
 0x731   :  { %v2744_v20 = vpack.c.bf16 %v1256_v17, %v1255_v16  ;;  %v2748_v21 = vpack.c.bf16 %v1258_v19, %v1257_v18 }
 0x733   :  { %2745 = vmatprep.subr.bf16.mxu1 %v2744_v20 }
 0x734   :  { %2747 = vmatpush3.bf16.msra.mxu1 %v2744_v20 }
 0x735   :  { %2749 = vmatprep.subr.bf16.mxu1 %v2748_v21 }
 0x738   :  { %2751 = vmatpush3.bf16.msra.mxu1 %v2748_v21 }
 0x739   :  { %2753 = vmatprep.subr.bf16.mxu1 %v2744_v20 }
 0x73b   :  { %2423 = vmatmul.mubr.msk.f32.vlgmr.msra.gmra.mrb[14].mxu1 %vm232_vm1, %v3607_v47  ;;  %v2768_v47 = vpack.c.bf16 %v1452_v33, %v1451_v32  ;;  %v1445_v32 = vld [vmem:[#allocation17 + $0xf0] sm:$0xff]  ;;  %v1446_v33 = vld [vmem:[#allocation17 + $0xf8] sm:$0xff] }
 0x73c   :  { %2755 = vmatpush3.bf16.msra.mxu1 %v2744_v20  ;;  %2425 = vmatprep.mubr.msk.f32.mxu1 %vm232_vm1, %v3611_v49  ;;  %v1453_v49 = vld [vmem:[#allocation17 + $0x30] sm:$0xff]  ;;  %v1440_v20 = vld [vmem:[#allocation17 + $0xc8] sm:$0xff] }
 0x73d   :  { %2757 = vmatprep.subr.bf16.mxu1 %v2748_v21  ;;  %v2808_v22 = vpack.c.bf16 %v1440_v20, %v1439_v11 }
 0x73f   :  { %2426 = vmatmul.mubr.msk.f32.gmra.mrb[16].mxu1 %vm232_vm1, %v3619_v56  ;;  %v1455_v56 = vld [vmem:[#allocation17 + $0x40] sm:$0xff] }
 0x740   :  { %2759 = vmatpush3.bf16.msra.mxu1 %v2748_v21  ;;  %2436 = vmatprep.mubr.msk.f32.mxu1 %vm232_vm1, %v3592_v24  ;;  %v2772_v24 = vpack.c.bf16 %v1454_v35, %v1453_v49  ;;  %v2776_v37 = vpack.c.bf16 %v1456_v23, %v1455_v56  ;;  %v1634_v49 = vld [vmem:[#allocation17 + $0x100] sm:$0xff]  ;;  %v1635_v35 = vld [vmem:[#allocation17 + $0x108] sm:$0xff]  ;;  %v1636_v56 = vld [vmem:[#allocation17 + $0x110] sm:$0xff] }
 0x741   :  { %2761 = vmatprep.subr.bf16.mxu1 %v2760_v27  ;;  %v1637_v23 = vld [vmem:[#allocation17 + $0x118] sm:$0xff] }
 0x743   :  { %2437 = vmatmul.mubr.msk.f32.vlgmr.msra.gmra.mrb[18].mxu1 %vm232_vm1, %v3609_v48  ;;  %v1457_v48 = vld [vmem:[#allocation17 + $0x50] sm:$0xff] }
 0x744   :  { %2439 = vmatprep.mubr.msk.f32.mxu1 %vm232_vm1, %v3613_v50  ;;  %2763 = vmatpush3.bf16.msra.mxu1 %v2760_v27  ;;  %v2780_v50 = vpack.c.bf16 %v1458_v38, %v1457_v48  ;;  %v1441_v27 = vld [vmem:[#allocation17 + $0xd0] sm:$0xff]  ;;  %v1638_v48 = vld [vmem:[#allocation17 + $0x120] sm:$0xff]  ;;  %v1639_v38 = vld [vmem:[#allocation17 + $0x128] sm:$0xff] }
 0x745   :  { %2765 = vmatprep.subr.bf16.mxu1 %v2764_v31  ;;  %v2812_v12 = vpack.c.bf16 %v1442_v29, %v1441_v27 }
 0x747   :  { %2440 = vmatmul.mubr.msk.f32.gmra.mrb[20].mxu1 %vm232_vm1, %v3623_v57  ;;  %v1462_v57 = vld [vmem:[#allocation17 + $0x78] sm:$0xff] }
 0x748   :  { %2767 = vmatpush3.bf16.msra.mxu1 %v2764_v31  ;;  %v2788_v46 = vpack.c.bf16 %v1462_v57, %v1461_v44  ;;  %v1642_v44 = vld [vmem:[#allocation17 + $0x140] sm:$0xff]  ;;  %v1643_v57 = vld [vmem:[#allocation17 + $0x148] sm:$0xff] }
 0x749   :  { %2769 = vmatprep.subr.bf16.mxu1 %v2768_v47  ;;  %v2840_v13 = vpack.c.bf16 %v1643_v57, %v1642_v44 }
 0x74c   :  { %2771 = vmatpush3.bf16.msra.mxu1 %v2768_v47  ;;  %v2820_v47 = vpack.c.bf16 %v1446_v33, %v1445_v32 }
 0x74d   :  { %2773 = vmatprep.subr.bf16.mxu1 %v2772_v24 }
 0x750   :  { %2775 = vmatpush3.bf16.msra.mxu1 %v2772_v24  ;;  %v2824_v24 = vpack.c.bf16 %v1635_v35, %v1634_v49 }
 0x751   :  { %2777 = vmatprep.subr.bf16.mxu1 %v2776_v37 }
 0x754   :  { %2779 = vmatpush3.bf16.msra.mxu1 %v2776_v37  ;;  %v2828_v37 = vpack.c.bf16 %v1637_v23, %v1636_v56  ;;  %v1749_v23 = vld [vmem:[#allocation20] sm:$0x1] }
 0x755   :  { %2781 = vmatprep.subr.bf16.mxu1 %v2780_v50 }
 0x758   :  { %2783 = vmatpush3.bf16.msra.mxu1 %v2780_v50  ;;  %v2832_v50 = vpack.c.bf16 %v1639_v38, %v1638_v48 }
 0x759   :  { %2785 = vmatprep.subr.bf16.mxu1 %v2784_v43 }
 0x75c   :  { %2787 = vmatpush3.bf16.msra.mxu1 %v2784_v43  ;;  %v2836_v43 = vpack.c.bf16 %v1641_v41, %v1640_v40 }
 0x75d   :  { %2789 = vmatprep.subr.bf16.mxu1 %v2788_v46 }
 0x760   :  { %2791 = vmatpush3.bf16.msra.mxu1 %v2788_v46  ;;  %v1646_v46 = vld [vmem:[#allocation17 + $0x160] sm:$0xff] }
 0x761   :  { %2793 = vmatprep.subr.bf16.mxu1 %v2792_v54  ;;  %v2848_v15 = vpack.c.bf16 %v1647_v51, %v1646_v46 }
 0x80e   :  { %v2424_v60 = vpop.f32.mrb[14].mxu1 }
 0x80f   :  { %v1326_v61 = vpop.f32.mrb[15].mxu1 }
 0x810   :  { %2474 = vmatprep.mubr.f32.mxu1 %v1326_v61 }
 0x811   :  { %2475 = vmatmul.mubr.f32.vlgmr.msra.gmra.mrb[22].mxu1 %v2424_v60 }
 0x812   :  { %2795 = vmatpush3.bf16.msra.mxu1 %v2792_v54  ;;  %v2427_v3 = vpop.f32.mrb[16].mxu1 }
 0x813   :  { %v1336_v4 = vpop.f32.mrb[17].mxu1  ;;  %2797 = vmatprep.subr.bf16.mxu1 %v2796_v62 }
 0x814   :  { %2477 = vmatprep.mubr.f32.mxu1 %v1336_v4 }
 0x815   :  { %2478 = vmatmul.mubr.f32.gmra.mrb[24].mxu1 %v2427_v3 }
 0x816   :  { %2799 = vmatpush3.bf16.msra.mxu1 %v2796_v62  ;;  %2512 = vmatprep.mubr.f32.mxu1 %v1255_v16  ;;  %v3807_v8 = vpop.f32.mrb[18].mxu1  ;;  %v1443_v16 = vld [vmem:[#allocation17 + $0xe0] sm:$0xff] }
 0x817   :  { %2801 = vmatprep.subr.bf16.mxu1 %v2800_v5  ;;  %v1411_v10 = vpop.f32.mrb[19].mxu1  ;;  %v2816_v31 = vpack.c.bf16 %v1444_v30, %v1443_v16 }
 0x81a   :  { %2803 = vmatpush3.bf16.msra.mxu1 %v2800_v5  ;;  %v3809_v21 = vpop.f32.mrb[20].mxu1 }
 0x81b   :  { %2805 = vmatprep.subr.bf16.mxu1 %v2804_v9  ;;  %v3811_v26 = vpop.f32.mrb[21].mxu1 }
 0x81e   :  { %2807 = vmatpush3.bf16.msra.mxu1 %v2804_v9 }
 0x81f   :  { %2809 = vmatprep.subr.bf16.mxu1 %v2808_v22 }
 0x822   :  { %2811 = vmatpush3.bf16.msra.mxu1 %v2808_v22 }
 0x823   :  { %2813 = vmatprep.subr.bf16.mxu1 %v2812_v12 }
 0x826   :  { %2815 = vmatpush3.bf16.msra.mxu1 %v2812_v12 }
 0x827   :  { %2817 = vmatprep.subr.bf16.mxu1 %v2816_v31 }
 0x82a   :  { %2819 = vmatpush3.bf16.msra.mxu1 %v2816_v31 }
 0x82b   :  { %2821 = vmatprep.subr.bf16.mxu1 %v2820_v47 }
 0x82e   :  { %2823 = vmatpush3.bf16.msra.mxu1 %v2820_v47 }
 0x82f   :  { %2825 = vmatprep.subr.bf16.mxu1 %v2824_v24 }
 0x831   :  { %2513 = vmatmul.mubr.f32.vlgmr.msra.gmra.mrb[22].mxu1 %v1256_v17  ;;  %v1644_v17 = vld [vmem:[#allocation17 + $0x150] sm:$0xff] }
 0x832   :  { %2515 = vmatprep.mubr.f32.mxu1 %v1257_v18  ;;  %2827 = vmatpush3.bf16.msra.mxu1 %v2824_v24  ;;  %v2844_v18 = vpack.c.bf16 %v1645_v14, %v1644_v17 }
 0x833   :  { %2829 = vmatprep.subr.bf16.mxu1 %v2828_v37 }
 0x835   :  { %2516 = vmatmul.mubr.f32.gmra.mrb[24].mxu1 %v1258_v19  ;;  %v1648_v19 = vld [vmem:[#allocation17 + $0x170] sm:$0xff] }
 0x836   :  { %2831 = vmatpush3.bf16.msra.mxu1 %v2828_v37  ;;  %2550 = vmatprep.mubr.f32.mxu1 %v1411_v10  ;;  %v2852_v54 = vpack.c.bf16 %v1649_v53, %v1648_v19 }
 0x837   :  { %2833 = vmatprep.subr.bf16.mxu1 %v2832_v50 }
 0x83a   :  { %2835 = vmatpush3.bf16.msra.mxu1 %v2832_v50  ;;  %v2017_v50 = vld [vmem:[#allocation22] ss:$0 sm:$0xff] }
 0x83b   :  { %2837 = vmatprep.subr.bf16.mxu1 %v2836_v43 }
 0x83e   :  { %2839 = vmatpush3.bf16.msra.mxu1 %v2836_v43 }
 0x83f   :  { %2841 = vmatprep.subr.bf16.mxu1 %v2840_v13 }
 0x842   :  { %2843 = vmatpush3.bf16.msra.mxu1 %v2840_v13 }
 0x843   :  { %2845 = vmatprep.subr.bf16.mxu1 %v2844_v18 }
 0x846   :  { %2847 = vmatpush3.bf16.msra.mxu1 %v2844_v18 }
 0x847   :  { %2849 = vmatprep.subr.bf16.mxu1 %v2848_v15 }
 0x84a   :  { %2851 = vmatpush3.bf16.msra.mxu1 %v2848_v15 }
 0x84b   :  { %2853 = vmatprep.subr.bf16.mxu1 %v2852_v54 }
 0x84e   :  { %2855 = vmatpush3.bf16.msra.mxu1 %v2852_v54 }
 0x851   :  { %2551 = vmatmul.mubr.f32.vlgmr.msra.gmra.mrb[22].mxu1 %v3807_v8 }
 0x852   :  { %2553 = vmatprep.mubr.f32.mxu1 %v3811_v26 }
 0x855   :  { %2554 = vmatmul.mubr.f32.gmra.mrb[24].mxu1 %v3809_v21 }
 0x924   :  { %v2552_v59 = vpop.f32.mrb[22].mxu1 }
 0x925   :  { %v1716_v60 = vpop.f32.mrb[23].mxu1  ;;  %v1746_v61 = vadd.f32 %v2552_v59, %v2016_v58 }
 0x926   :  { %v1745_v62 = vadd.f32 %v2016_v58, %v1716_v60 }
 0x928   :  { %v2555_v63 = vpop.f32.mrb[24].mxu1  ;;  %v1751_v3 = vadd.f32 %v1746_v61, %v1745_v62 }
 0x929   :  { %v1726_v2 = vpop.f32.mrb[25].mxu1  ;;  %v1748_v5 = vadd.f32 %v2555_v63, %v2016_v58 }
 0x92a   :  { %v1747_v4 = vadd.f32 %v2016_v58, %v1726_v2 }
 0x92c   :  { %v1752_v6 = vadd.f32 %v1751_v3, %v1747_v4 }
 0x92e   :  { %v1753_v7 = vadd.f32 %v1752_v6, %v1748_v5 }
 0x930   :  { %v1754_v9 = vrot.slane %v1753_v7, 4 }
 0x932   :  { %v1755_v10 = vadd.f32 %v1754_v9, %v1753_v7 }
 0x934   :  { %v1756_v11 = vrot.slane %v1755_v10, 2 }
 0x936   :  { %v1757_v8 = vadd.f32 %v1756_v11, %v1755_v10 }
 0x938   :  { %v1758_v20 = vrot.slane %v1757_v8, 1 }
 0x93a   :  { %v1759_v22 = vadd.f32 %v1758_v20, %v1757_v8 }
 0x93c   :  { %v1760_v26 = vmul.f32 0.03125, %v1759_v22 }
 0x93e   :  { %2589 = vmatmul.mubr.f32.vlgmr.msra.gmra.mrb[14].mxu0 %v1760_v26 }
 0x93f   :  { %2882 = vmatpush3.bf16.msra.mxu0 %v3645_v25  ;;  %2623 = vmatprep.mubr.msk.f32.mxu0 %vm3283_vm0, %v3284_v1 }
 0x940   :  { %2883 = vmatprep.subr.bf16.mxu0 %v3282_v0 }
 0x943   :  { %2885 = vmatpush3.bf16.msra.mxu0 %v3667_v34 }
 0x944   :  { %2886 = vmatprep.subr.bf16.mxu0 %v3282_v0 }
 0x947   :  { %2888 = vmatpush3.bf16.msra.mxu0 %v3677_v36 }
 0x948   :  { %2889 = vmatprep.subr.bf16.mxu0 %v3282_v0 }
 0x94b   :  { %2891 = vmatpush3.bf16.msra.mxu0 %v3687_v39 }
 0x94c   :  { %2892 = vmatprep.subr.bf16.mxu0 %v3282_v0 }
 0x94f   :  { %2894 = vmatpush3.bf16.msra.mxu0 %v3697_v42 }
 0x950   :  { %2895 = vmatprep.subr.bf16.mxu0 %v3282_v0 }
 0x953   :  { %2897 = vmatpush3.bf16.msra.mxu0 %v3707_v45 }
 0x954   :  { %2898 = vmatprep.subr.bf16.mxu0 %v3282_v0 }
 0x957   :  { %2900 = vmatpush3.bf16.msra.mxu0 %v3717_v52 }
 0x958   :  { %2901 = vmatprep.subr.bf16.mxu0 %v3282_v0 }
 0x95b   :  { %2903 = vmatpush3.bf16.msra.mxu0 %v3727_v55 }
 0xa11   :  { %v1827_v1 = vpop.f32.mrb[14].mxu0 }
 0xa12   :  { %v1834_v25 = vrot.slane %v1827_v1, %v3749_v28  ;;  %v2590_v34 = vpop.f32.mrb[15].mxu0 }
 0xa14   :  { %v1835_v36 = vsub.f32 %v1745_v62, %v1834_v25  ;;  %v1836_v39 = vsub.f32 %v1746_v61, %v1834_v25  ;;  %v1837_v21 = vsub.f32 %v1747_v4, %v1834_v25  ;;  %v1838_v42 = vsub.f32 %v1748_v5, %v1834_v25 }
 0xa16   :  { %v1839_v27 = vmul.f32 %v1835_v36, %v1835_v36  ;;  %v1840_v29 = vmul.f32 %v1836_v39, %v1836_v39  ;;  %v1841_v12 = vmul.f32 %v1837_v21, %v1837_v21  ;;  %v1842_v16 = vmul.f32 %v1838_v42, %v1838_v42 }
 0xa18   :  { %v1843_v45 = vadd.f32 %v1840_v29, %v1839_v27 }
 0xa1a   :  { %v1844_v30 = vadd.f32 %v1843_v45, %v1841_v12 }
 0xa1c   :  { %v1845_v31 = vadd.f32 %v1844_v30, %v1842_v16 }
 0xa1e   :  { %v1846_v52 = vrot.slane %v1845_v31, 4 }
 0xa20   :  { %v1847_v32 = vadd.f32 %v1846_v52, %v1845_v31 }
 0xa22   :  { %v1848_v0 = vrot.slane %v1847_v32, 2 }
 0xa24   :  { %v1849_v33 = vadd.f32 %v1848_v0, %v1847_v32 }
 0xa26   :  { %v1850_v55 = vrot.slane %v1849_v33, 1 }
 0xa28   :  { %v1851_v47 = vadd.f32 %v1850_v55, %v1849_v33 }
 0xa2a   :  { %v1852_v49 = vmul.f32 0.03125, %v1851_v47 }
 0xa2c   :  { %2624 = vmatmul.mubr.f32.vlgmr.msra.gmra.mrb[16].mxu0 %v1852_v49 }
 0xaff   :  { %v1919_v35 = vpop.f32.mrb[16].mxu0 }
 0xb00   :  { %v1920_v24 = vadd.f32 1e-05, %v1919_v35  ;;  %v2625_v56 = vpop.f32.mrb[17].mxu0 }
 0xb02   :  { %2941 = vrsqrt.f32 %v1920_v24 }
 0xb0c   :  { %v2942_v37 = vpop.eup %2941 }
 0xb0d   :  { %v1924_v48 = vmul.f32 %v2942_v37, %v1749_v23 }
 0xb0f   :  { %v1929_v38 = vrot.slane %v1924_v48, %v3749_v28 }
 0xb11   :  { %v1931_v40 = vmul.f32 %v1929_v38, %v1835_v36  ;;  %v1932_v41 = vmul.f32 %v1929_v38, %v1836_v39  ;;  %v1933_v43 = vmul.f32 %v1929_v38, %v1837_v21  ;;  %v1934_v44 = vmul.f32 %v1929_v38, %v1838_v42 }
 0xb13   :  { %v1941_v57 = vadd.f32 %v2017_v50, %v1931_v40  ;;  %v1942_v13 = vadd.f32 %v2017_v50, %v1932_v41  ;;  %v1943_v17 = vadd.f32 %v2017_v50, %v1933_v43  ;;  %v1944_v14 = vadd.f32 %v2017_v50, %v1934_v44 }
 0xb15   :  { %v1945_v18 = vmax.f32 %v1941_v57, 0.0  ;;  %v1946_v46 = vmax.f32 %v1942_v13, 0.0  ;;  %v1947_v51 = vmax.f32 %v1943_v17, 0.0  ;;  %v1948_v15 = vmax.f32 %v1944_v14, 0.0 }
 0xb17   :  { %1949 = vst [vmem:[#allocation23] sm:$0xff] %v1945_v18  ;;  %1950 = vst [vmem:[#allocation23 + $0x8] sm:$0xff] %v1946_v46 }
 0xb18   :  { %1951 = vst [vmem:[#allocation23 + $0x10] sm:$0xff] %v1947_v51  ;;  %1952 = vst [vmem:[#allocation23 + $0x18] sm:$0xff] %v1948_v15 }
 0xb19   :  { %3240 = shalt.err (!%p3237_p10)
}
 0xb1a   :  { %s3241_s22 = scalar_lea.hbm %s3874_s18, 512 }
 0xb1b   :  { %p3242_p11 = scmp.ne.s32.totalorder %s3874_s18, %s3241_s22  ;;  %p3245_p12 = scmp.lt.u32.totalorder %s3241_s22, %s3874_s18 }
 0xb1d   :  { %p3247_p13 = pnand %p3245_p12, %p3242_p11 }
 0xb1f   :  { %3250 = shalt.err (!%p3247_p13)
}
 0xb20   :  { %1964 = dma.vmem_to_hbm [thread:$0]  %s1959_s16, 512, %s3874_s18, [#allocation4], %s3270_s28, %s3270_s28, %s3271_s2  }
 0xb21   :  { %3265 = dma.done.wait [#allocation4], 512  }
 0xb22   :  { %3266 = vsyncadd [#allocation4], 4294966784 }
 0xb23   :  { %1968 = vsyncpa [#allocation3], 1 }
 0xb24   :  { %1969 = vsyncpa [#allocation6], 1 }
 0xb25   :  { %1970 = vsyncpa [#allocation9], 1 }
 0xb26   :  { %1971 = vsyncpa [#allocation12], 1 }
 0xb27   :  { %1972 = vsyncpa [#allocation15], 1 }
 0xb28   :  { %1973 = vsyncpa [#allocation18], 1 }
 0xb29   :  { %1974 = vsyncpa [#allocation21], 1 }
 0xb2a   :  { %1975 = vsyncpa [#allocation4], 1 }

</bundles_post_ra>
